<compile_context>
chip_gen: v5e
topology: v5e:2x2
jax: 0.10.0
libtpu: 0.0.40
codegen_flags: <defaults>
</compile_context>

<pallas_src>
import functools
import math

import jax
import jax.numpy as jnp
from jax.experimental import pallas as pl
from jax.experimental.pallas import tpu as pltpu


# ---------------------------------------------------------------------------
# Kernel: one batch image per grid step.
#   x_ref  : (1, C, H*W)  channel-first, spatial flattened (lane-dense)
#   w1_ref : (C, Cr)      w1[c, j] = con1.weight[j, c, 0, 0]
#   wh_ref : (C, Cr)      wh[c, k] = h_con.weight[c, k, 0, 0]
#   ww_ref : (C, Cr)      ww[c, k] = w_con.weight[c, k, 0, 0]
# ---------------------------------------------------------------------------
def ca_kernel(x_ref, w1_ref, wh_ref, ww_ref, out_ref, *, H, W):
    C = x_ref.shape[1]
    Cr = w1_ref.shape[1]

    x = x_ref[0]                                        # (C, H*W) one dense load

    # Row chunks: chunks[h][c, w] == x[c, h, w]  (contiguous lane slices).
    chunks = [x[:, h * W:(h + 1) * W] for h in range(H)]      # H x (C, W)

    # AdaptiveMaxPool2d((1, w)): max over H -> (C, W)
    mw = chunks[0]
    for h in range(1, H):
        mw = jnp.maximum(mw, chunks[h])

    # AdaptiveMaxPool2d((h, 1)): max over W -> (C, H)
    mh = jnp.concatenate(
        [jnp.max(c, axis=1, keepdims=True) for c in chunks], axis=1)

    # torch.cat((input_h, input_w), 3)  ->  (C, H+W), channel-first.
    seq = jnp.concatenate([mh, mw], axis=1)             # (C, H+W)

    # con1: 1x1 conv C -> Cr (no bias). Contraction over C done as Cr
    # VPU multiplies + sublane reductions (skip the MXU: K=32, N=32, M=Cr).
    t_rows = [jnp.sum(seq * w1_ref[:, j:j + 1], axis=0, keepdims=True)
              for j in range(Cr)]                       # Cr x (1, H+W)
    t = jnp.concatenate(t_rows, axis=0)                 # (Cr, H+W)

    # h_wish: x * relu6(x + 3) / 6
    t = t * (jnp.clip(t + 3.0, 0.0, 6.0) * (1.0 / 6.0))

    th = t[:, :H]                                       # (Cr, H)
    tw = t[:, H:]                                       # (Cr, W)

    # h_con / w_con: 1x1 convs Cr -> C, computed as Cr broadcast FMAs each
    # (VPU outer products; K=Cr=2 would waste the MXU systolic depth).
    sh = jnp.zeros((C, H), jnp.float32)
    sw = jnp.zeros((C, W), jnp.float32)
    for k in range(Cr):
        sh = sh + wh_ref[:, k:k + 1] * th[k:k + 1, :]
        sw = sw + ww_ref[:, k:k + 1] * tw[k:k + 1, :]
    gh = jax.nn.sigmoid(sh)                             # (C, H) gate per row
    gw = jax.nn.sigmoid(sw)                             # (C, W) gate per col

    # out[c, h, w] = x[c, h, w] * gh[c, h] * gw[c, w]; assembled as one
    # lane-dense (C, H*W) slab so the store is unmasked / full-width.
    out_chunks = [chunks[h] * gh[:, h:h + 1] * gw for h in range(H)]
    out_ref[0] = jnp.concatenate(out_chunks, axis=1)    # (C, H*W)


# ---------------------------------------------------------------------------
# Wrapper: NCHW in / NCHW out (PyTorch convention), no transposes.
# ---------------------------------------------------------------------------
def ca_block(x_nchw, w1, wh, ww):
    N, C, H, W = x_nchw.shape
    Cr = w1.shape[1]
    S = H * W

    # Free view: merging the two trailing contiguous dims is layout-preserving.
    x2 = x_nchw.reshape(N, C, S)

    act_spec = pl.BlockSpec((1, C, S), lambda n: (n, 0, 0))
    w_spec = pl.BlockSpec((C, Cr), lambda n: (0, 0))

    kern = functools.partial(ca_kernel, H=H, W=W)
    out = pl.pallas_call(
        kern,
        out_shape=jax.ShapeDtypeStruct((N, C, S), jnp.float32),
        grid=(N,),
        in_specs=[act_spec, w_spec, w_spec, w_spec],
        out_specs=act_spec,
        compiler_params=pltpu.CompilerParams(dimension_semantics=("parallel",)),
    )(x2, w1, wh, ww)
    return out.reshape(N, C, H, W)


# ---------------------------------------------------------------------------
# Pure-JAX reference (same math, XLA ops) for correctness checking.
# ---------------------------------------------------------------------------
def ca_block_ref(x, w1, wh, ww):
    N, C, H, W = x.shape
    mh = jnp.max(x, axis=3)                              # (N, C, H)
    mw = jnp.max(x, axis=2)                              # (N, C, W)
    seq = jnp.concatenate([mh, mw], axis=2)              # (N, C, H+W)
    t = jnp.sum(seq[:, :, None, :] * w1[None, :, :, None], axis=1)   # (N, Cr, H+W)
    t = t * (jnp.clip(t + 3.0, 0.0, 6.0) / 6.0)
    th, tw = t[:, :, :H], t[:, :, H:]
    gh = jax.nn.sigmoid(jnp.sum(wh[None, :, :, None] * th[:, None, :, :], axis=2))
    gw = jax.nn.sigmoid(jnp.sum(ww[None, :, :, None] * tw[:, None, :, :], axis=2))
    return x * gh[:, :, :, None] * gw[:, :, None, :]


# ---------------------------------------------------------------------------
# Deterministic parameter init (matches the nn.Conv2d weight shapes; stored
# channel-major as documented above the kernel).
# ---------------------------------------------------------------------------
def init_params(key, C, reduction=16):
    Cr = max(C // reduction, 1)
    k1, k2, k3 = jax.random.split(key, 3)
    w1 = jax.random.normal(k1, (C, Cr), jnp.float32) / math.sqrt(C)
    wh = jax.random.normal(k2, (C, Cr), jnp.float32) / math.sqrt(Cr)
    ww = jax.random.normal(k3, (C, Cr), jnp.float32) / math.sqrt(Cr)
    return w1, wh, ww


if __name__ == "__main__":
    # Ca_block(channel=32, h=16, w=16, reduction=16) -> Cr = 2
    N, C, H, W = 2, 32, 16, 16

    key = jax.random.PRNGKey(0)
    kx, kp = jax.random.split(key)
    x = jax.random.normal(kx, (N, C, H, W), jnp.float32)
    w1, wh, ww = init_params(kp, C, reduction=16)

    out = jax.jit(ca_block)(x, w1, wh, ww)
    out = jax.block_until_ready(out)
    assert out.shape == (N, C, H, W) and out.dtype == jnp.float32

    ref = ca_block_ref(x, w1, wh, ww)
    max_err = float(jnp.max(jnp.abs(out - ref)))
    assert max_err < 1e-3, f"kernel vs reference mismatch: {max_err}"

    print("KERNEL_OK")
</pallas_src>

<mosaic_0001>
module attributes {stable_mosaic.version = 11 : i64} {
  func.func @ca_kernel(%arg0: i32, %arg1: memref<1x32x256xf32, #tpu.memory_space<vmem>>, %arg2: memref<32x2xf32, #tpu.memory_space<vmem>>, %arg3: memref<32x2xf32, #tpu.memory_space<vmem>>, %arg4: memref<32x2xf32, #tpu.memory_space<vmem>>, %arg5: memref<1x32x256xf32, #tpu.memory_space<vmem>>) attributes {dimension_semantics = [#tpu.dimension_semantics<parallel>], iteration_bounds = array<i64: 2>, scalar_prefetch = 0 : i64, scratch_operands = 0 : i64, tpu.core_type = #tpu.core_type<tc>, window_params = [{transform_indices = @transform_0, window_bounds = array<i64: 1, 32, 256>}, {pipeline_mode = #tpu.pipeline_mode<synchronous>, transform_indices = @transform_1, window_bounds = array<i64: 32, 2>}, {pipeline_mode = #tpu.pipeline_mode<synchronous>, transform_indices = @transform_2, window_bounds = array<i64: 32, 2>}, {pipeline_mode = #tpu.pipeline_mode<synchronous>, transform_indices = @transform_3, window_bounds = array<i64: 32, 2>}, {transform_indices = @transform_4, window_bounds = array<i64: 1, 32, 256>}]} {
    %c0 = arith.constant 0 : index
    %c0_0 = arith.constant 0 : index
    %c0_1 = arith.constant 0 : index
    %0 = vector.load %arg1[%c0, %c0_0, %c0_1] : memref<1x32x256xf32, #tpu.memory_space<vmem>>, vector<1x32x256xf32>
    %1 = vector.shape_cast %0 : vector<1x32x256xf32> to vector<32x256xf32>
    %2 = vector.extract_strided_slice %1 {offsets = [0, 0], sizes = [32, 16], strides = [1, 1]} : vector<32x256xf32> to vector<32x16xf32>
    %3 = vector.extract_strided_slice %1 {offsets = [0, 16], sizes = [32, 16], strides = [1, 1]} : vector<32x256xf32> to vector<32x16xf32>
    %4 = vector.extract_strided_slice %1 {offsets = [0, 32], sizes = [32, 16], strides = [1, 1]} : vector<32x256xf32> to vector<32x16xf32>
    %5 = vector.extract_strided_slice %1 {offsets = [0, 48], sizes = [32, 16], strides = [1, 1]} : vector<32x256xf32> to vector<32x16xf32>
    %6 = vector.extract_strided_slice %1 {offsets = [0, 64], sizes = [32, 16], strides = [1, 1]} : vector<32x256xf32> to vector<32x16xf32>
    %7 = vector.extract_strided_slice %1 {offsets = [0, 80], sizes = [32, 16], strides = [1, 1]} : vector<32x256xf32> to vector<32x16xf32>
    %8 = vector.extract_strided_slice %1 {offsets = [0, 96], sizes = [32, 16], strides = [1, 1]} : vector<32x256xf32> to vector<32x16xf32>
    %9 = vector.extract_strided_slice %1 {offsets = [0, 112], sizes = [32, 16], strides = [1, 1]} : vector<32x256xf32> to vector<32x16xf32>
    %10 = vector.extract_strided_slice %1 {offsets = [0, 128], sizes = [32, 16], strides = [1, 1]} : vector<32x256xf32> to vector<32x16xf32>
    %11 = vector.extract_strided_slice %1 {offsets = [0, 144], sizes = [32, 16], strides = [1, 1]} : vector<32x256xf32> to vector<32x16xf32>
    %12 = vector.extract_strided_slice %1 {offsets = [0, 160], sizes = [32, 16], strides = [1, 1]} : vector<32x256xf32> to vector<32x16xf32>
    %13 = vector.extract_strided_slice %1 {offsets = [0, 176], sizes = [32, 16], strides = [1, 1]} : vector<32x256xf32> to vector<32x16xf32>
    %14 = vector.extract_strided_slice %1 {offsets = [0, 192], sizes = [32, 16], strides = [1, 1]} : vector<32x256xf32> to vector<32x16xf32>
    %15 = vector.extract_strided_slice %1 {offsets = [0, 208], sizes = [32, 16], strides = [1, 1]} : vector<32x256xf32> to vector<32x16xf32>
    %16 = vector.extract_strided_slice %1 {offsets = [0, 224], sizes = [32, 16], strides = [1, 1]} : vector<32x256xf32> to vector<32x16xf32>
    %17 = vector.extract_strided_slice %1 {offsets = [0, 240], sizes = [32, 16], strides = [1, 1]} : vector<32x256xf32> to vector<32x16xf32>
    %18 = arith.maximumf %2, %3 : vector<32x16xf32>
    %19 = arith.maximumf %18, %4 : vector<32x16xf32>
    %20 = arith.maximumf %19, %5 : vector<32x16xf32>
    %21 = arith.maximumf %20, %6 : vector<32x16xf32>
    %22 = arith.maximumf %21, %7 : vector<32x16xf32>
    %23 = arith.maximumf %22, %8 : vector<32x16xf32>
    %24 = arith.maximumf %23, %9 : vector<32x16xf32>
    %25 = arith.maximumf %24, %10 : vector<32x16xf32>
    %26 = arith.maximumf %25, %11 : vector<32x16xf32>
    %27 = arith.maximumf %26, %12 : vector<32x16xf32>
    %28 = arith.maximumf %27, %13 : vector<32x16xf32>
    %29 = arith.maximumf %28, %14 : vector<32x16xf32>
    %30 = arith.maximumf %29, %15 : vector<32x16xf32>
    %31 = arith.maximumf %30, %16 : vector<32x16xf32>
    %32 = arith.maximumf %31, %17 : vector<32x16xf32>
    %cst = arith.constant dense<0xFF800000> : vector<32xf32>
    %33 = vector.multi_reduction <maximumf>, %2, %cst [1] : vector<32x16xf32> to vector<32xf32>
    %34 = vector.shape_cast %33 : vector<32xf32> to vector<32x1xf32>
    %cst_2 = arith.constant dense<0xFF800000> : vector<32xf32>
    %35 = vector.multi_reduction <maximumf>, %3, %cst_2 [1] : vector<32x16xf32> to vector<32xf32>
    %36 = vector.shape_cast %35 : vector<32xf32> to vector<32x1xf32>
    %cst_3 = arith.constant dense<0xFF800000> : vector<32xf32>
    %37 = vector.multi_reduction <maximumf>, %4, %cst_3 [1] : vector<32x16xf32> to vector<32xf32>
    %38 = vector.shape_cast %37 : vector<32xf32> to vector<32x1xf32>
    %cst_4 = arith.constant dense<0xFF800000> : vector<32xf32>
    %39 = vector.multi_reduction <maximumf>, %5, %cst_4 [1] : vector<32x16xf32> to vector<32xf32>
    %40 = vector.shape_cast %39 : vector<32xf32> to vector<32x1xf32>
    %cst_5 = arith.constant dense<0xFF800000> : vector<32xf32>
    %41 = vector.multi_reduction <maximumf>, %6, %cst_5 [1] : vector<32x16xf32> to vector<32xf32>
    %42 = vector.shape_cast %41 : vector<32xf32> to vector<32x1xf32>
    %cst_6 = arith.constant dense<0xFF800000> : vector<32xf32>
    %43 = vector.multi_reduction <maximumf>, %7, %cst_6 [1] : vector<32x16xf32> to vector<32xf32>
    %44 = vector.shape_cast %43 : vector<32xf32> to vector<32x1xf32>
    %cst_7 = arith.constant dense<0xFF800000> : vector<32xf32>
    %45 = vector.multi_reduction <maximumf>, %8, %cst_7 [1] : vector<32x16xf32> to vector<32xf32>
    %46 = vector.shape_cast %45 : vector<32xf32> to vector<32x1xf32>
    %cst_8 = arith.constant dense<0xFF800000> : vector<32xf32>
    %47 = vector.multi_reduction <maximumf>, %9, %cst_8 [1] : vector<32x16xf32> to vector<32xf32>
    %48 = vector.shape_cast %47 : vector<32xf32> to vector<32x1xf32>
    %cst_9 = arith.constant dense<0xFF800000> : vector<32xf32>
    %49 = vector.multi_reduction <maximumf>, %10, %cst_9 [1] : vector<32x16xf32> to vector<32xf32>
    %50 = vector.shape_cast %49 : vector<32xf32> to vector<32x1xf32>
    %cst_10 = arith.constant dense<0xFF800000> : vector<32xf32>
    %51 = vector.multi_reduction <maximumf>, %11, %cst_10 [1] : vector<32x16xf32> to vector<32xf32>
    %52 = vector.shape_cast %51 : vector<32xf32> to vector<32x1xf32>
    %cst_11 = arith.constant dense<0xFF800000> : vector<32xf32>
    %53 = vector.multi_reduction <maximumf>, %12, %cst_11 [1] : vector<32x16xf32> to vector<32xf32>
    %54 = vector.shape_cast %53 : vector<32xf32> to vector<32x1xf32>
    %cst_12 = arith.constant dense<0xFF800000> : vector<32xf32>
    %55 = vector.multi_reduction <maximumf>, %13, %cst_12 [1] : vector<32x16xf32> to vector<32xf32>
    %56 = vector.shape_cast %55 : vector<32xf32> to vector<32x1xf32>
    %cst_13 = arith.constant dense<0xFF800000> : vector<32xf32>
    %57 = vector.multi_reduction <maximumf>, %14, %cst_13 [1] : vector<32x16xf32> to vector<32xf32>
    %58 = vector.shape_cast %57 : vector<32xf32> to vector<32x1xf32>
    %cst_14 = arith.constant dense<0xFF800000> : vector<32xf32>
    %59 = vector.multi_reduction <maximumf>, %15, %cst_14 [1] : vector<32x16xf32> to vector<32xf32>
    %60 = vector.shape_cast %59 : vector<32xf32> to vector<32x1xf32>
    %cst_15 = arith.constant dense<0xFF800000> : vector<32xf32>
    %61 = vector.multi_reduction <maximumf>, %16, %cst_15 [1] : vector<32x16xf32> to vector<32xf32>
    %62 = vector.shape_cast %61 : vector<32xf32> to vector<32x1xf32>
    %cst_16 = arith.constant dense<0xFF800000> : vector<32xf32>
    %63 = vector.multi_reduction <maximumf>, %17, %cst_16 [1] : vector<32x16xf32> to vector<32xf32>
    %64 = vector.shape_cast %63 : vector<32xf32> to vector<32x1xf32>
    %65 = tpu.concatenate %34, %36, %38, %40, %42, %44, %46, %48, %50, %52, %54, %56, %58, %60, %62, %64 in 1 : vector<32x1xf32>, vector<32x1xf32>, vector<32x1xf32>, vector<32x1xf32>, vector<32x1xf32>, vector<32x1xf32>, vector<32x1xf32>, vector<32x1xf32>, vector<32x1xf32>, vector<32x1xf32>, vector<32x1xf32>, vector<32x1xf32>, vector<32x1xf32>, vector<32x1xf32>, vector<32x1xf32>, vector<32x1xf32> -> vector<32x16xf32>
    %66 = tpu.concatenate %65, %32 in 1 : vector<32x16xf32>, vector<32x16xf32> -> vector<32x32xf32>
    %c0_17 = arith.constant 0 : index
    %c0_18 = arith.constant 0 : index
    %67 = vector.load %arg2[%c0_17, %c0_18] : memref<32x2xf32, #tpu.memory_space<vmem>>, vector<32x1xf32>
    %68 = vector.broadcast %67 : vector<32x1xf32> to vector<32x32xf32>
    %69 = arith.mulf %66, %68 : vector<32x32xf32>
    %cst_19 = arith.constant dense<0.000000e+00> : vector<32xf32>
    %70 = vector.multi_reduction <add>, %69, %cst_19 [0] : vector<32x32xf32> to vector<32xf32>
    %71 = vector.shape_cast %70 : vector<32xf32> to vector<1x32xf32>
    %c0_20 = arith.constant 0 : index
    %c1 = arith.constant 1 : index
    %72 = vector.load %arg2[%c0_20, %c1] : memref<32x2xf32, #tpu.memory_space<vmem>>, vector<32x1xf32>
    %73 = vector.broadcast %72 : vector<32x1xf32> to vector<32x32xf32>
    %74 = arith.mulf %66, %73 : vector<32x32xf32>
    %cst_21 = arith.constant dense<0.000000e+00> : vector<32xf32>
    %75 = vector.multi_reduction <add>, %74, %cst_21 [0] : vector<32x32xf32> to vector<32xf32>
    %76 = vector.shape_cast %75 : vector<32xf32> to vector<1x32xf32>
    %77 = tpu.concatenate %71, %76 in 0 : vector<1x32xf32>, vector<1x32xf32> -> vector<2x32xf32>
    %cst_22 = arith.constant 3.000000e+00 : f32
    %78 = vector.broadcast %cst_22 : f32 to vector<2x32xf32>
    %79 = arith.addf %77, %78 : vector<2x32xf32>
    %cst_23 = arith.constant 0.000000e+00 : f32
    %cst_24 = arith.constant 6.000000e+00 : f32
    %80 = vector.broadcast %cst_23 : f32 to vector<2x32xf32>
    %81 = arith.maximumf %80, %79 : vector<2x32xf32>
    %82 = vector.broadcast %cst_24 : f32 to vector<2x32xf32>
    %83 = arith.minimumf %82, %81 : vector<2x32xf32>
    %cst_25 = arith.constant 0.166666672 : f32
    %84 = vector.broadcast %cst_25 : f32 to vector<2x32xf32>
    %85 = arith.mulf %83, %84 : vector<2x32xf32>
    %86 = arith.mulf %77, %85 : vector<2x32xf32>
    %87 = vector.extract_strided_slice %86 {offsets = [0, 0], sizes = [2, 16], strides = [1, 1]} : vector<2x32xf32> to vector<2x16xf32>
    %88 = vector.extract_strided_slice %86 {offsets = [0, 16], sizes = [2, 16], strides = [1, 1]} : vector<2x32xf32> to vector<2x16xf32>
    %cst_26 = arith.constant 0.000000e+00 : f32
    %89 = vector.broadcast %cst_26 : f32 to vector<32x16xf32>
    %cst_27 = arith.constant 0.000000e+00 : f32
    %90 = vector.broadcast %cst_27 : f32 to vector<32x16xf32>
    %c0_28 = arith.constant 0 : index
    %c0_29 = arith.constant 0 : index
    %91 = vector.load %arg3[%c0_28, %c0_29] : memref<32x2xf32, #tpu.memory_space<vmem>>, vector<32x1xf32>
    %92 = vector.extract_strided_slice %87 {offsets = [0, 0], sizes = [1, 16], strides = [1, 1]} : vector<2x16xf32> to vector<1x16xf32>
    %93 = vector.broadcast %91 : vector<32x1xf32> to vector<32x16xf32>
    %94 = vector.broadcast %92 : vector<1x16xf32> to vector<32x16xf32>
    %95 = arith.mulf %93, %94 : vector<32x16xf32>
    %96 = arith.addf %89, %95 : vector<32x16xf32>
    %c0_30 = arith.constant 0 : index
    %c0_31 = arith.constant 0 : index
    %97 = vector.load %arg4[%c0_30, %c0_31] : memref<32x2xf32, #tpu.memory_space<vmem>>, vector<32x1xf32>
    %98 = vector.extract_strided_slice %88 {offsets = [0, 0], sizes = [1, 16], strides = [1, 1]} : vector<2x16xf32> to vector<1x16xf32>
    %99 = vector.broadcast %97 : vector<32x1xf32> to vector<32x16xf32>
    %100 = vector.broadcast %98 : vector<1x16xf32> to vector<32x16xf32>
    %101 = arith.mulf %99, %100 : vector<32x16xf32>
    %102 = arith.addf %90, %101 : vector<32x16xf32>
    %c0_32 = arith.constant 0 : index
    %c1_33 = arith.constant 1 : index
    %103 = vector.load %arg3[%c0_32, %c1_33] : memref<32x2xf32, #tpu.memory_space<vmem>>, vector<32x1xf32>
    %104 = vector.extract_strided_slice %87 {offsets = [1, 0], sizes = [1, 16], strides = [1, 1]} : vector<2x16xf32> to vector<1x16xf32>
    %105 = vector.broadcast %103 : vector<32x1xf32> to vector<32x16xf32>
    %106 = vector.broadcast %104 : vector<1x16xf32> to vector<32x16xf32>
    %107 = arith.mulf %105, %106 : vector<32x16xf32>
    %108 = arith.addf %96, %107 : vector<32x16xf32>
    %c0_34 = arith.constant 0 : index
    %c1_35 = arith.constant 1 : index
    %109 = vector.load %arg4[%c0_34, %c1_35] : memref<32x2xf32, #tpu.memory_space<vmem>>, vector<32x1xf32>
    %110 = vector.extract_strided_slice %88 {offsets = [1, 0], sizes = [1, 16], strides = [1, 1]} : vector<2x16xf32> to vector<1x16xf32>
    %111 = vector.broadcast %109 : vector<32x1xf32> to vector<32x16xf32>
    %112 = vector.broadcast %110 : vector<1x16xf32> to vector<32x16xf32>
    %113 = arith.mulf %111, %112 : vector<32x16xf32>
    %114 = arith.addf %102, %113 : vector<32x16xf32>
    %115 = arith.negf %108 : vector<32x16xf32>
    %116 = math.exp %115 : vector<32x16xf32>
    %cst_36 = arith.constant 1.000000e+00 : f32
    %117 = vector.broadcast %cst_36 : f32 to vector<32x16xf32>
    %118 = arith.addf %117, %116 : vector<32x16xf32>
    %119 = arith.divf %117, %118 : vector<32x16xf32>
    %120 = arith.negf %114 : vector<32x16xf32>
    %121 = math.exp %120 : vector<32x16xf32>
    %cst_37 = arith.constant 1.000000e+00 : f32
    %122 = vector.broadcast %cst_37 : f32 to vector<32x16xf32>
    %123 = arith.addf %122, %121 : vector<32x16xf32>
    %124 = arith.divf %122, %123 : vector<32x16xf32>
    %125 = vector.extract_strided_slice %119 {offsets = [0, 0], sizes = [32, 1], strides = [1, 1]} : vector<32x16xf32> to vector<32x1xf32>
    %126 = vector.broadcast %125 : vector<32x1xf32> to vector<32x16xf32>
    %127 = arith.mulf %2, %126 : vector<32x16xf32>
    %128 = arith.mulf %127, %124 : vector<32x16xf32>
    %129 = vector.extract_strided_slice %119 {offsets = [0, 1], sizes = [32, 1], strides = [1, 1]} : vector<32x16xf32> to vector<32x1xf32>
    %130 = vector.broadcast %129 : vector<32x1xf32> to vector<32x16xf32>
    %131 = arith.mulf %3, %130 : vector<32x16xf32>
    %132 = arith.mulf %131, %124 : vector<32x16xf32>
    %133 = vector.extract_strided_slice %119 {offsets = [0, 2], sizes = [32, 1], strides = [1, 1]} : vector<32x16xf32> to vector<32x1xf32>
    %134 = vector.broadcast %133 : vector<32x1xf32> to vector<32x16xf32>
    %135 = arith.mulf %4, %134 : vector<32x16xf32>
    %136 = arith.mulf %135, %124 : vector<32x16xf32>
    %137 = vector.extract_strided_slice %119 {offsets = [0, 3], sizes = [32, 1], strides = [1, 1]} : vector<32x16xf32> to vector<32x1xf32>
    %138 = vector.broadcast %137 : vector<32x1xf32> to vector<32x16xf32>
    %139 = arith.mulf %5, %138 : vector<32x16xf32>
    %140 = arith.mulf %139, %124 : vector<32x16xf32>
    %141 = vector.extract_strided_slice %119 {offsets = [0, 4], sizes = [32, 1], strides = [1, 1]} : vector<32x16xf32> to vector<32x1xf32>
    %142 = vector.broadcast %141 : vector<32x1xf32> to vector<32x16xf32>
    %143 = arith.mulf %6, %142 : vector<32x16xf32>
    %144 = arith.mulf %143, %124 : vector<32x16xf32>
    %145 = vector.extract_strided_slice %119 {offsets = [0, 5], sizes = [32, 1], strides = [1, 1]} : vector<32x16xf32> to vector<32x1xf32>
    %146 = vector.broadcast %145 : vector<32x1xf32> to vector<32x16xf32>
    %147 = arith.mulf %7, %146 : vector<32x16xf32>
    %148 = arith.mulf %147, %124 : vector<32x16xf32>
    %149 = vector.extract_strided_slice %119 {offsets = [0, 6], sizes = [32, 1], strides = [1, 1]} : vector<32x16xf32> to vector<32x1xf32>
    %150 = vector.broadcast %149 : vector<32x1xf32> to vector<32x16xf32>
    %151 = arith.mulf %8, %150 : vector<32x16xf32>
    %152 = arith.mulf %151, %124 : vector<32x16xf32>
    %153 = vector.extract_strided_slice %119 {offsets = [0, 7], sizes = [32, 1], strides = [1, 1]} : vector<32x16xf32> to vector<32x1xf32>
    %154 = vector.broadcast %153 : vector<32x1xf32> to vector<32x16xf32>
    %155 = arith.mulf %9, %154 : vector<32x16xf32>
    %156 = arith.mulf %155, %124 : vector<32x16xf32>
    %157 = vector.extract_strided_slice %119 {offsets = [0, 8], sizes = [32, 1], strides = [1, 1]} : vector<32x16xf32> to vector<32x1xf32>
    %158 = vector.broadcast %157 : vector<32x1xf32> to vector<32x16xf32>
    %159 = arith.mulf %10, %158 : vector<32x16xf32>
    %160 = arith.mulf %159, %124 : vector<32x16xf32>
    %161 = vector.extract_strided_slice %119 {offsets = [0, 9], sizes = [32, 1], strides = [1, 1]} : vector<32x16xf32> to vector<32x1xf32>
    %162 = vector.broadcast %161 : vector<32x1xf32> to vector<32x16xf32>
    %163 = arith.mulf %11, %162 : vector<32x16xf32>
    %164 = arith.mulf %163, %124 : vector<32x16xf32>
    %165 = vector.extract_strided_slice %119 {offsets = [0, 10], sizes = [32, 1], strides = [1, 1]} : vector<32x16xf32> to vector<32x1xf32>
    %166 = vector.broadcast %165 : vector<32x1xf32> to vector<32x16xf32>
    %167 = arith.mulf %12, %166 : vector<32x16xf32>
    %168 = arith.mulf %167, %124 : vector<32x16xf32>
    %169 = vector.extract_strided_slice %119 {offsets = [0, 11], sizes = [32, 1], strides = [1, 1]} : vector<32x16xf32> to vector<32x1xf32>
    %170 = vector.broadcast %169 : vector<32x1xf32> to vector<32x16xf32>
    %171 = arith.mulf %13, %170 : vector<32x16xf32>
    %172 = arith.mulf %171, %124 : vector<32x16xf32>
    %173 = vector.extract_strided_slice %119 {offsets = [0, 12], sizes = [32, 1], strides = [1, 1]} : vector<32x16xf32> to vector<32x1xf32>
    %174 = vector.broadcast %173 : vector<32x1xf32> to vector<32x16xf32>
    %175 = arith.mulf %14, %174 : vector<32x16xf32>
    %176 = arith.mulf %175, %124 : vector<32x16xf32>
    %177 = vector.extract_strided_slice %119 {offsets = [0, 13], sizes = [32, 1], strides = [1, 1]} : vector<32x16xf32> to vector<32x1xf32>
    %178 = vector.broadcast %177 : vector<32x1xf32> to vector<32x16xf32>
    %179 = arith.mulf %15, %178 : vector<32x16xf32>
    %180 = arith.mulf %179, %124 : vector<32x16xf32>
    %181 = vector.extract_strided_slice %119 {offsets = [0, 14], sizes = [32, 1], strides = [1, 1]} : vector<32x16xf32> to vector<32x1xf32>
    %182 = vector.broadcast %181 : vector<32x1xf32> to vector<32x16xf32>
    %183 = arith.mulf %16, %182 : vector<32x16xf32>
    %184 = arith.mulf %183, %124 : vector<32x16xf32>
    %185 = vector.extract_strided_slice %119 {offsets = [0, 15], sizes = [32, 1], strides = [1, 1]} : vector<32x16xf32> to vector<32x1xf32>
    %186 = vector.broadcast %185 : vector<32x1xf32> to vector<32x16xf32>
    %187 = arith.mulf %17, %186 : vector<32x16xf32>
    %188 = arith.mulf %187, %124 : vector<32x16xf32>
    %189 = tpu.concatenate %128, %132, %136, %140, %144, %148, %152, %156, %160, %164, %168, %172, %176, %180, %184, %188 in 1 : vector<32x16xf32>, vector<32x16xf32>, vector<32x16xf32>, vector<32x16xf32>, vector<32x16xf32>, vector<32x16xf32>, vector<32x16xf32>, vector<32x16xf32>, vector<32x16xf32>, vector<32x16xf32>, vector<32x16xf32>, vector<32x16xf32>, vector<32x16xf32>, vector<32x16xf32>, vector<32x16xf32>, vector<32x16xf32> -> vector<32x256xf32>
    %c0_38 = arith.constant 0 : index
    %c0_39 = arith.constant 0 : index
    %c0_40 = arith.constant 0 : index
    %190 = vector.load %arg5[%c0_38, %c0_39, %c0_40] : memref<1x32x256xf32, #tpu.memory_space<vmem>>, vector<1x32x256xf32>
    %191 = vector.shape_cast %190 : vector<1x32x256xf32> to vector<32x256xf32>
    %192 = vector.shape_cast %189 : vector<32x256xf32> to vector<1x32x256xf32>
    tpu.vector_store %arg5[%c0_38, %c0_39, %c0_40], %192 {strides = array<i32>} : memref<1x32x256xf32, #tpu.memory_space<vmem>>, vector<1x32x256xf32>,
    return
  }
  func.func @transform_0(%arg0: i32) -> (i32, i32, i32) {
    %c0_i32 = arith.constant 0 : i32
    %c0_i32_0 = arith.constant 0 : i32
    %c0_i32_1 = arith.constant 0 : i32
    return %arg0, %c0_i32, %c0_i32_0 : i32, i32, i32
  }
  func.func @transform_1(%arg0: i32) -> (i32, i32) {
    %c0_i32 = arith.constant 0 : i32
    %c0_i32_0 = arith.constant 0 : i32
    %c0_i32_1 = arith.constant 0 : i32
    return %c0_i32, %c0_i32_0 : i32, i32
  }
  func.func @transform_2(%arg0: i32) -> (i32, i32) {
    %c0_i32 = arith.constant 0 : i32
    %c0_i32_0 = arith.constant 0 : i32
    %c0_i32_1 = arith.constant 0 : i32
    return %c0_i32, %c0_i32_0 : i32, i32
  }
  func.func @transform_3(%arg0: i32) -> (i32, i32) {
    %c0_i32 = arith.constant 0 : i32
    %c0_i32_0 = arith.constant 0 : i32
    %c0_i32_1 = arith.constant 0 : i32
    return %c0_i32, %c0_i32_0 : i32, i32
  }
  func.func @transform_4(%arg0: i32) -> (i32, i32, i32) {
    %c0_i32 = arith.constant 0 : i32
    %c0_i32_0 = arith.constant 0 : i32
    %c0_i32_1 = arith.constant 0 : i32
    return %arg0, %c0_i32, %c0_i32_0 : i32, i32, i32
  }
}

</mosaic_0001>

<bundles_post_ra>
// kernel: ca_block.1
= control target key start
LH: loop header
LB: loop body
LE: loop exit
PB: predicated region body
PF: predicated region fallthrough
CT: control target
= control target key end

     0   :  { %s1889_s15 = smov 0   ;;  %s3120_s0 = inlined_call_operand.vmem [shape: f32[2,32,256], index: 0, kind: input, shape index: {}]   ;;  %s3121_s1 = inlined_call_operand.vmem [shape: f32[32,2], index: 1, kind: input, shape index: {}]   ;;  %s3122_s2 = inlined_call_operand.vmem [shape: f32[32,2], index: 2, kind: input, shape index: {}]   ;;  %s3123_s3 = inlined_call_operand.vmem [shape: f32[32,2], index: 3, kind: input, shape index: {}]   ;;  %s3124_s4 = inlined_call_operand.vmem [shape: f32[2,32,256], index: 4, kind: output, shape index: {}]  }
   0x1 LB: > { %s1685_s16 = sadd.s32 4294967295, %s1839_s15   ;;  %p1689_p0 = scmp.ge.s32.totalorder %s1839_s15, 1  ;;  %s1839_s15 = sphi %s1889_s15, %s14_s15  }
   0x2   : > { %p162_p1 = scmp.lt.s32.totalorder %s1839_s15, 3 }
   0x4   : > { %p163_p2 = pnand %p1689_p0, %p162_p1 }
   0x6   : > { %166 = sbr.rel (%p163_p2) target bundleno = 1104 (0x450), region = 36 }
   0xb   : > { %p188_p3 = scmp.lt.s32.totalorder %s1685_s16, 1  ;;  %s1841_s21 = smov 112   ;;  %vm442_vm0 = vcmask 130048   ;;  %vm455_vm1 = vcmask 261248   ;;  %vm468_vm2 = vcmask 392448   ;;  %vm481_vm3 = vcmask 523648  }
   0xc   : > { %s1842_s22 = smov 96   ;;  %s1843_s23 = smov 80   ;;  %vm494_vm4 = vcmask 654848   ;;  %vm507_vm5 = vcmask 786048   ;;  %vm520_vm6 = vcmask 917248   ;;  %vm533_vm7 = vcmask 1048448  }
   0xd   : > { %s3174_s16 = smov (!%p188_p3, %s1685_s16), 1  ;;  %s1844_s24 = smov 64   ;;  %vm642_vm8 = vcmask 7168   ;;  %vm647_vm9 = vcmask 15360   ;;  %vm657_vm10 = vcmask 31744   ;;  %vm652_vm11 = vcmask 23552  }
   0xe   : > { %s1704_s17 = sshll.u32 %s3174_s16, 6  ;;  %s1845_s25 = smov 48   ;;  %vm662_vm12 = vcmask 39936   ;;  %vm667_vm13 = vcmask 48128   ;;  %vm672_vm14 = vcmask 56320   ;;  %vm677_vm15 = vcmask 64512  }
   0xf   : > { %s1905_s20 = scalar_lea.vmem %s3120_s0, %s1704_s17  ;;  %s1846_s26 = smov 32  }
  0x10   : > { %v1908_v0 = vld [vmem:[%s1905_s20 + $0x20] sm:$0xff]  ;;  %v1920_v2 = vld [vmem:[%s1905_s20 + $0x30] sm:$0xff]  ;;  %s1847_s27 = smov 16   ;;  %v1974_v4 = vld [vmem:[%s1905_s20 + $0x8] sm:$0xff] }
  0x11   : > { %v1911_v1 = vld [vmem:[%s1905_s20] sm:$0xff]  ;;  %214 = vrot.lane.b32.xlu1 %v1908_v0, %s1841_s21  ;;  %v1923_v3 = vld [vmem:[%s1905_s20 + $0x10] sm:$0xff]  ;;  %v1977_v5 = vld [vmem:[%s1905_s20 + $0x18] sm:$0xff]  ;;  %v452_v30 = vsel %vm442_vm0, %v1920_v2, -inf  ;;  %v449_v32 = vsel %vm442_vm0, %v1908_v0, -inf  ;;  %v462_v37 = vsel %vm455_vm1, %v1908_v0, -inf }
  0x12   : > { %226 = vrot.lane.b32.xlu2 %v1911_v1, %s1842_s22  ;;  %210 = vrot.lane.b32.xlu0 %v1911_v1, %s1841_s21  ;;  %v1986_v6 = vld [vmem:[%s1905_s20 + $0x38] sm:$0xff]  ;;  %v1989_v7 = vld [vmem:[%s1905_s20 + $0x28] sm:$0xff]  ;;  %v443_v29 = vsel %vm442_vm0, %v1911_v1, -inf  ;;  %v446_v35 = vsel %vm442_vm0, %v1923_v3, -inf  ;;  %v456_v36 = vsel %vm455_vm1, %v1911_v1, -inf  ;;  %v459_v38 = vsel %vm455_vm1, %v1923_v3, -inf }
  0x13   : > { %v465_v42 = vsel %vm455_vm1, %v1920_v2, -inf  ;;  %v472_v43 = vsel %vm468_vm2, %v1923_v3, -inf  ;;  %v469_v44 = vsel %vm468_vm2, %v1911_v1, -inf  ;;  %v475_v48 = vsel %vm468_vm2, %v1908_v0, -inf }
  0x14   : > { %v482_v49 = vsel %vm481_vm3, %v1911_v1, -inf  ;;  %v478_v50 = vsel %vm468_vm2, %v1920_v2, -inf  ;;  %v485_v54 = vsel %vm481_vm3, %v1923_v3, -inf  ;;  %v491_v55 = vsel %vm481_vm3, %v1920_v2, -inf }
  0x15   : > { %v488_v56 = vsel %vm481_vm3, %v1908_v0, -inf  ;;  %v495_v57 = vsel %vm494_vm4, %v1911_v1, -inf  ;;  %v501_v59 = vsel %vm494_vm4, %v1908_v0, -inf  ;;  %v498_v62 = vsel %vm494_vm4, %v1923_v3, -inf }
  0x16   : > { %v504_v63 = vsel %vm494_vm4, %v1920_v2, -inf }
  0x19   : > { %216 = vrot.lane.b32.xlu1 %v1920_v2, %s1841_s21 }
  0x1a   : > { %228 = vrot.lane.b32.xlu2 %v1923_v3, %s1842_s22  ;;  %212 = vrot.lane.b32.xlu0 %v1923_v3, %s1841_s21 }
  0x21   : > { %232 = vrot.lane.b32.xlu1 %v1920_v2, %s1842_s22 }
  0x22   : > { %242 = vrot.lane.b32.xlu2 %v1911_v1, %s1843_s23  ;;  %230 = vrot.lane.b32.xlu0 %v1908_v0, %s1842_s22 }
  0x29   : > { %246 = vrot.lane.b32.xlu1 %v1908_v0, %s1843_s23 }
  0x2a   : > { %248 = vrot.lane.b32.xlu2 %v1920_v2, %s1843_s23  ;;  %244 = vrot.lane.b32.xlu0 %v1923_v3, %s1843_s23 }
  0x31   : > { %260 = vrot.lane.b32.xlu1 %v1923_v3, %s1844_s24 }
  0x32   : > { %262 = vrot.lane.b32.xlu2 %v1908_v0, %s1844_s24  ;;  %258 = vrot.lane.b32.xlu0 %v1911_v1, %s1844_s24 }
  0x39   : > { %274 = vrot.lane.b32.xlu1 %v1911_v1, %s1845_s25 }
  0x3a   : > { %276 = vrot.lane.b32.xlu2 %v1923_v3, %s1845_s25  ;;  %264 = vrot.lane.b32.xlu0 %v1920_v2, %s1844_s24 }
  0x41   : > { %280 = vrot.lane.b32.xlu1 %v1920_v2, %s1845_s25 }
  0x42   : > { %290 = vrot.lane.b32.xlu2 %v1911_v1, %s1846_s26  ;;  %278 = vrot.lane.b32.xlu0 %v1908_v0, %s1845_s25 }
  0x49   : > { %294 = vrot.lane.b32.xlu1 %v1908_v0, %s1846_s26 }
  0x4a   : > { %296 = vrot.lane.b32.xlu2 %v1920_v2, %s1846_s26  ;;  %292 = vrot.lane.b32.xlu0 %v1923_v3, %s1846_s26 }
  0x51   : > { %308 = vrot.lane.b32.xlu1 %v1923_v3, %s1847_s27 }
  0x52   : > { %310 = vrot.lane.b32.xlu2 %v1908_v0, %s1847_s27  ;;  %306 = vrot.lane.b32.xlu0 %v1911_v1, %s1847_s27 }
  0x59   : > { %330 = vrot.lane.b32.xlu1 %v1974_v4, %s1841_s21 }
  0x5a   : > { %332 = vrot.lane.b32.xlu2 %v1977_v5, %s1841_s21  ;;  %312 = vrot.lane.b32.xlu0 %v1920_v2, %s1847_s27 }
  0x61   : > { %336 = vrot.lane.b32.xlu1 %v1986_v6, %s1841_s21 }
  0x62   : > { %346 = vrot.lane.b32.xlu2 %v1974_v4, %s1842_s22  ;;  %334 = vrot.lane.b32.xlu0 %v1989_v7, %s1841_s21 }
  0x69   : > { %350 = vrot.lane.b32.xlu1 %v1989_v7, %s1842_s22 }
  0x6a   : > { %352 = vrot.lane.b32.xlu2 %v1986_v6, %s1842_s22  ;;  %348 = vrot.lane.b32.xlu0 %v1977_v5, %s1842_s22 }
  0x6c   : > { %v2025_v10 = vpop.permute.xlu2 %226 }
  0x71   : > { %364 = vrot.lane.b32.xlu1 %v1977_v5, %s1843_s23 }
  0x72   : > { %366 = vrot.lane.b32.xlu2 %v1989_v7, %s1843_s23  ;;  %362 = vrot.lane.b32.xlu0 %v1974_v4, %s1843_s23 }
  0x74   : > { %v2037_v13 = vpop.permute.xlu2 %228 }
  0x79   : > { %378 = vrot.lane.b32.xlu1 %v1974_v4, %s1844_s24 }
  0x7a   : > { %380 = vrot.lane.b32.xlu2 %v1977_v5, %s1844_s24  ;;  %368 = vrot.lane.b32.xlu0 %v1986_v6, %s1843_s23 }
  0x7c   : > { %v2049_v16 = vpop.permute.xlu2 %242 }
  0x81   : > { %384 = vrot.lane.b32.xlu1 %v1986_v6, %s1844_s24 }
  0x82   : > { %394 = vrot.lane.b32.xlu2 %v1974_v4, %s1845_s25  ;;  %382 = vrot.lane.b32.xlu0 %v1989_v7, %s1844_s24 }
  0x83   : > { %v2021_v8 = vpop.permute.xlu1 %214 }
  0x84   : > { %v2023_v9 = vpop.permute.xlu0 %210  ;;  %v2059_v18 = vpop.permute.xlu2 %248 }
  0x89   : > { %398 = vrot.lane.b32.xlu1 %v1989_v7, %s1845_s25 }
  0x8a   : > { %400 = vrot.lane.b32.xlu2 %v1986_v6, %s1845_s25  ;;  %396 = vrot.lane.b32.xlu0 %v1977_v5, %s1845_s25 }
  0x8b   : > { %v2033_v11 = vpop.permute.xlu1 %216 }
  0x8c   : > { %v2035_v12 = vpop.permute.xlu0 %212  ;;  %v2069_v21 = vpop.permute.xlu2 %262 }
  0x91   : > { %412 = vrot.lane.b32.xlu1 %v1977_v5, %s1846_s26 }
  0x92   : > { %414 = vrot.lane.b32.xlu2 %v1989_v7, %s1846_s26  ;;  %410 = vrot.lane.b32.xlu0 %v1974_v4, %s1846_s26 }
  0x93   : > { %v2045_v14 = vpop.permute.xlu1 %232 }
  0x94   : > { %v2047_v15 = vpop.permute.xlu0 %230  ;;  %v2075_v24 = vpop.permute.xlu2 %276 }
  0x99   : > { %426 = vrot.lane.b32.xlu1 %v1974_v4, %s1847_s27 }
  0x9a   : > { %428 = vrot.lane.b32.xlu2 %v1977_v5, %s1847_s27  ;;  %416 = vrot.lane.b32.xlu0 %v1986_v6, %s1846_s26 }
  0x9b   : > { %v2057_v17 = vpop.permute.xlu1 %246 }
  0x9c   : > { %v2061_v19 = vpop.permute.xlu0 %244  ;;  %v2081_v27 = vpop.permute.xlu2 %290 }
  0xa1   : > { %432 = vrot.lane.b32.xlu1 %v1986_v6, %s1847_s27 }
  0xa2   : > { %430 = vrot.lane.b32.xlu0 %v1989_v7, %s1847_s27 }
  0xa3   : > { %v2067_v20 = vpop.permute.xlu1 %260 }
  0xa4   : > { %v2071_v22 = vpop.permute.xlu0 %258  ;;  %v2093_v33 = vpop.permute.xlu2 %296 }
  0xab   : > { %v2073_v23 = vpop.permute.xlu1 %274 }
  0xac   : > { %v2077_v25 = vpop.permute.xlu0 %264  ;;  %v2107_v40 = vpop.permute.xlu2 %310 }
  0xb3   : > { %v2079_v26 = vpop.permute.xlu1 %280 }
  0xb4   : > { %v2083_v28 = vpop.permute.xlu0 %278  ;;  %v2119_v46 = vpop.permute.xlu2 %332 }
  0xbb   : > { %v2089_v31 = vpop.permute.xlu1 %294 }
  0xbc   : > { %v2095_v34 = vpop.permute.xlu0 %292  ;;  %v2131_v52 = vpop.permute.xlu2 %346 }
  0xc3   : > { %444 = vmax.xlane.f32.xlu2 %v443_v29  ;;  %v2105_v39 = vpop.permute.xlu1 %308  ;;  %v511_v29 = vsel %vm507_vm5, %v1923_v3, -inf }
  0xc4   : > { %v2109_v41 = vpop.permute.xlu0 %306  ;;  %v2147_v60 = vpop.permute.xlu2 %352 }
  0xc5   : > { %3125 = vst [vmem:[#allocation2_spill] sm:$0xff] %v2147_v60  ;;  %v615_v60 = vsel %vm507_vm5, %v1986_v6, -inf }
  0xcb   : > { %453 = vmax.xlane.f32.xlu2 %v452_v30  ;;  %450 = vmax.xlane.f32.xlu1 %v449_v32  ;;  %v2117_v45 = vpop.permute.xlu1 %330  ;;  %v508_v30 = vsel %vm507_vm5, %v1911_v1, -inf }
  0xcc   : > { %447 = vmax.xlane.f32.xlu0 %v446_v35  ;;  %v2121_v47 = vpop.permute.xlu0 %312  ;;  %v2161_v35 = vpop.permute.xlu2 %366 }
  0xcd   : > { %3126 = vst [vmem:[#allocation3_spill] sm:$0xff] %v2161_v35 }
  0xd3   : > { %457 = vmax.xlane.f32.xlu2 %v456_v36  ;;  %463 = vmax.xlane.f32.xlu1 %v462_v37  ;;  %v2129_v51 = vpop.permute.xlu1 %336  ;;  %v514_v37 = vsel %vm507_vm5, %v1908_v0, -inf }
  0xd4   : > { %460 = vmax.xlane.f32.xlu0 %v459_v38  ;;  %v2133_v53 = vpop.permute.xlu0 %334  ;;  %v521_v38 = vsel %vm520_vm6, %v1911_v1, -inf }
  0xdb   : > { %466 = vmax.xlane.f32.xlu2 %v465_v42  ;;  %473 = vmax.xlane.f32.xlu1 %v472_v43  ;;  %v2143_v58 = vpop.permute.xlu1 %350  ;;  %v517_v42 = vsel %vm507_vm5, %v1920_v2, -inf }
  0xdc   : > { %470 = vmax.xlane.f32.xlu0 %v469_v44  ;;  %v2149_v61 = vpop.permute.xlu0 %348  ;;  %v2173_v44 = vpop.permute.xlu2 %380 }
  0xe3   : > { %476 = vmax.xlane.f32.xlu2 %v475_v48  ;;  %483 = vmax.xlane.f32.xlu1 %v482_v49  ;;  %v2159_v32 = vpop.permute.xlu1 %364  ;;  %v524_v49 = vsel %vm520_vm6, %v1923_v3, -inf }
  0xe4   : > { %479 = vmax.xlane.f32.xlu0 %v478_v50  ;;  %v2163_v36 = vpop.permute.xlu0 %362  ;;  %v530_v50 = vsel %vm520_vm6, %v1920_v2, -inf }
  0xeb   : > { %486 = vmax.xlane.f32.xlu2 %v485_v54  ;;  %492 = vmax.xlane.f32.xlu1 %v491_v55  ;;  %v2171_v43 = vpop.permute.xlu1 %378  ;;  %v527_v54 = vsel %vm520_vm6, %v1908_v0, -inf }
  0xec   : > { %489 = vmax.xlane.f32.xlu0 %v488_v56  ;;  %3127 = vst [vmem:[#allocation4_spill] sm:$0xff] %v2171_v43  ;;  %v2175_v48 = vpop.permute.xlu0 %368  ;;  %v2185_v56 = vpop.permute.xlu2 %394 }
  0xed   : > { %3128 = vst [vmem:[#allocation5_spill] sm:$0xff] %v2175_v48 }
  0xee   : > { %3130 = vst [vmem:[#allocation7_spill] sm:$0xff] %v2185_v56  ;;  %v597_v56 = vsel %vm494_vm4, %v1977_v5, -inf }
  0xf3   : > { %496 = vmax.xlane.f32.xlu2 %v495_v57  ;;  %502 = vmax.xlane.f32.xlu1 %v501_v59  ;;  %v2183_v55 = vpop.permute.xlu1 %384  ;;  %v534_v59 = vsel %vm533_vm7, %v1911_v1, -inf }
  0xf4   : > { %499 = vmax.xlane.f32.xlu0 %v498_v62  ;;  %3129 = vst [vmem:[#allocation6_spill] sm:$0xff] %v2183_v55  ;;  %v2187_v57 = vpop.permute.xlu0 %382  ;;  %v540_v62 = vsel %vm533_vm7, %v1908_v0, -inf }
  0xf5   : > { %3131 = vst [vmem:[#allocation8_spill] sm:$0xff] %v2187_v57 }
  0xfb   : > { %505 = vmax.xlane.f32.xlu2 %v504_v63  ;;  %512 = vmax.xlane.f32.xlu1 %v511_v29  ;;  %v537_v63 = vsel %vm533_vm7, %v1923_v3, -inf  ;;  %v543_v29 = vsel %vm533_vm7, %v1920_v2, -inf }
  0xfc   : > { %509 = vmax.xlane.f32.xlu0 %v508_v30  ;;  %v2197_v30 = vpop.permute.xlu1 %398 }
  0xfd   : > { %3132 = vst [vmem:[#allocation9_spill] sm:$0xff] %v2197_v30  ;;  %v591_v30 = vsel %vm481_vm3, %v1986_v6, -inf }
 0x103   : > { %515 = vmax.xlane.f32.xlu2 %v514_v37  ;;  %522 = vmax.xlane.f32.xlu1 %v521_v38  ;;  %v549_v37 = vsel %vm442_vm0, %v1977_v5, -inf  ;;  %v2201_v38 = vpop.permute.xlu2 %400 }
 0x104   : > { %518 = vmax.xlane.f32.xlu0 %v517_v42  ;;  %3133 = vst [vmem:[#allocation10_spill] sm:$0xff] %v2201_v38  ;;  %v2203_v42 = vpop.permute.xlu0 %396 }
 0x105   : > { %3134 = vst [vmem:[#allocation11_spill] sm:$0xff] %v2203_v42  ;;  %v222_v42 = vmax.f32 %v1911_v1, %v2023_v9 }
 0x10b   : > { %525 = vmax.xlane.f32.xlu2 %v524_v49  ;;  %531 = vmax.xlane.f32.xlu1 %v530_v50  ;;  %v546_v49 = vsel %vm442_vm0, %v1974_v4, -inf  ;;  %v552_v50 = vsel %vm442_vm0, %v1989_v7, -inf }
 0x10c   : > { %528 = vmax.xlane.f32.xlu0 %v527_v54  ;;  %v558_v54 = vsel %vm455_vm1, %v1974_v4, -inf  ;;  %v2217_v38 = vpop.permute.xlu0 %410 }
 0x10d   : > { %3137 = vst [vmem:[#allocation14_spill] sm:$0xff] %v2217_v38  ;;  %v573_v38 = vsel %vm468_vm2, %v1977_v5, -inf }
 0x113   : > { %535 = vmax.xlane.f32.xlu2 %v534_v59  ;;  %541 = vmax.xlane.f32.xlu1 %v540_v62  ;;  %v555_v59 = vsel %vm442_vm0, %v1986_v6, -inf  ;;  %v2213_v62 = vpop.permute.xlu1 %412 }
 0x114   : > { %538 = vmax.xlane.f32.xlu0 %v537_v63  ;;  %3135 = vst [vmem:[#allocation12_spill] sm:$0xff] %v2213_v62  ;;  %v2215_v63 = vpop.permute.xlu2 %414  ;;  %v600_v62 = vsel %vm494_vm4, %v1989_v7, -inf }
 0x115   : > { %3136 = vst [vmem:[#allocation13_spill] sm:$0xff] %v2215_v63  ;;  %v2229_v63 = vpop.permute.xlu0 %416 }
 0x116   : > { %3140 = vst [vmem:[#allocation17_spill] sm:$0xff] %v2229_v63  ;;  %v579_v63 = vsel %vm468_vm2, %v1986_v6, -inf }
 0x11b   : > { %544 = vmax.xlane.f32.xlu2 %v543_v29  ;;  %550 = vmax.xlane.f32.xlu1 %v549_v37  ;;  %v561_v29 = vsel %vm455_vm1, %v1977_v5, -inf  ;;  %v567_v37 = vsel %vm455_vm1, %v1986_v6, -inf  ;;  %v2225_v55 = vpop.permute.xlu1 %426 }
 0x11c   : > { %547 = vmax.xlane.f32.xlu0 %v546_v49  ;;  %v564_v49 = vsel %vm455_vm1, %v1989_v7, -inf  ;;  %3138 = vst [vmem:[#allocation15_spill] sm:$0xff] %v2225_v55  ;;  %v585_v55 = vsel %vm481_vm3, %v1977_v5, -inf  ;;  %vm682_vm1 = vcmask 72704  }
 0x123   : > { %553 = vmax.xlane.f32.xlu2 %v552_v50  ;;  %559 = vmax.xlane.f32.xlu1 %v558_v54  ;;  %v2227_v50 = vpop.permute.xlu2 %428  ;;  %v570_v54 = vsel %vm468_vm2, %v1974_v4, -inf }
 0x124   : > { %556 = vmax.xlane.f32.xlu0 %v555_v59  ;;  %3139 = vst [vmem:[#allocation16_spill] sm:$0xff] %v2227_v50  ;;  %v576_v59 = vsel %vm468_vm2, %v1989_v7, -inf  ;;  %v582_v50 = vsel %vm481_vm3, %v1974_v4, -inf  ;;  %vm687_vm2 = vcmask 80896  }
 0x12b   : > { %562 = vmax.xlane.f32.xlu2 %v561_v29  ;;  %568 = vmax.xlane.f32.xlu1 %v567_v37  ;;  %v2239_v37 = vpop.permute.xlu1 %432 }
 0x12c   : > { %565 = vmax.xlane.f32.xlu0 %v564_v49  ;;  %3141 = vst [vmem:[#allocation18_spill] sm:$0xff] %v2239_v37  ;;  %v2241_v49 = vpop.permute.xlu0 %430  ;;  %v588_v37 = vsel %vm481_vm3, %v1989_v7, -inf  ;;  %vm692_vm3 = vcmask 89088  }
 0x12d   : > { %3142 = vst [vmem:[#allocation19_spill] sm:$0xff] %v2241_v49  ;;  %v594_v49 = vsel %vm494_vm4, %v1974_v4, -inf }
 0x133   : > { %571 = vmax.xlane.f32.xlu2 %v570_v54  ;;  %577 = vmax.xlane.f32.xlu1 %v576_v59 }
 0x134   : > { %574 = vmax.xlane.f32.xlu0 %v573_v38 }
 0x136   : > { %v2237_v29 = vpop.xlane.xlu2 %444 }
 0x13b   : > { %580 = vmax.xlane.f32.xlu2 %v579_v63  ;;  %586 = vmax.xlane.f32.xlu1 %v585_v55 }
 0x13c   : > { %583 = vmax.xlane.f32.xlu0 %v582_v50 }
 0x13e   : > { %v2249_v54 = vpop.xlane.xlu2 %453  ;;  %v2251_v38 = vpop.xlane.xlu1 %450 }
 0x13f   : > { %3143 = vst [vmem:[#allocation20_spill] sm:$0xff] %v2251_v38  ;;  %v448_v59 = vpop.xlane.xlu0 %447  ;;  %v603_v38 = vsel %vm494_vm4, %v1986_v6, -inf  ;;  %vm697_vm4 = vcmask 97280  }
 0x143   : > { %589 = vmax.xlane.f32.xlu2 %v588_v37  ;;  %595 = vmax.xlane.f32.xlu1 %v594_v49 }
 0x144   : > { %592 = vmax.xlane.f32.xlu0 %v591_v30 }
 0x146   : > { %v2259_v55 = vpop.xlane.xlu2 %457  ;;  %v2261_v63 = vpop.xlane.xlu1 %463 }
 0x147   : > { %3144 = vst [vmem:[#allocation21_spill] sm:$0xff] %v2261_v63  ;;  %v461_v50 = vpop.xlane.xlu0 %460  ;;  %v606_v63 = vsel %vm507_vm5, %v1974_v4, -inf }
 0x148   : > { %v644_v48 = vsel %vm642_vm8, %v448_v59, %v461_v50  ;;  %v612_v59 = vsel %vm507_vm5, %v1989_v7, -inf  ;;  %v609_v50 = vsel %vm507_vm5, %v1977_v5, -inf  ;;  %vm702_vm5 = vcmask 105472  }
 0x14b   : > { %598 = vmax.xlane.f32.xlu2 %v597_v56  ;;  %604 = vmax.xlane.f32.xlu1 %v603_v38 }
 0x14c   : > { %601 = vmax.xlane.f32.xlu0 %v600_v62  ;;  %v223_v62 = vmax.f32 %v1923_v3, %v2035_v12  ;;  %v224_v3 = vmax.f32 %v1908_v0, %v2021_v8  ;;  %v238_v12 = vmax.f32 %v222_v42, %v2025_v10  ;;  %v624_v0 = vsel %vm520_vm6, %v1989_v7, -inf }
 0x14d   : > { %v630_v10 = vsel %vm533_vm7, %v1974_v4, -inf }
 0x14e   : > { %v2270_v30 = vpop.xlane.xlu2 %466  ;;  %v474_v37 = vpop.xlane.xlu1 %473  ;;  %v240_v1 = vmax.f32 %v224_v3, %v2047_v15  ;;  %v254_v8 = vmax.f32 %v238_v12, %v2049_v16 }
 0x14f   : > { %v2272_v49 = vpop.xlane.xlu0 %470 }
 0x153   : > { %607 = vmax.xlane.f32.xlu2 %v606_v63  ;;  %613 = vmax.xlane.f32.xlu1 %v612_v59  ;;  %v621_v63 = vsel %vm520_vm6, %v1977_v5, -inf  ;;  %v618_v59 = vsel %vm520_vm6, %v1974_v4, -inf }
 0x154   : > { %610 = vmax.xlane.f32.xlu0 %v609_v50  ;;  %v239_v50 = vmax.f32 %v223_v62, %v2037_v13  ;;  %v225_v13 = vmax.f32 %v1920_v2, %v2033_v11 }
 0x156   : > { %v2280_v56 = vpop.xlane.xlu2 %476  ;;  %v2284_v38 = vpop.xlane.xlu1 %483  ;;  %v241_v15 = vmax.f32 %v225_v13, %v2045_v14 }
 0x157   : > { %3145 = vst [vmem:[#allocation22_spill] sm:$0xff] %v2280_v56  ;;  %v2286_v57 = vpop.xlane.xlu0 %479  ;;  %v255_v56 = vmax.f32 %v239_v50, %v2061_v19  ;;  %v627_v19 = vsel %vm520_vm6, %v1986_v6, -inf  ;;  %vm707_vm6 = vcmask 113664  }
 0x158   : > { %v257_v42 = vmax.f32 %v241_v15, %v2059_v18  ;;  %v633_v18 = vsel %vm533_vm7, %v1977_v5, -inf }
 0x159   : > { %v271_v43 = vmax.f32 %v255_v56, %v2067_v20  ;;  %v270_v20 = vmax.f32 %v254_v8, %v2071_v22 }
 0x15b   : > { %616 = vmax.xlane.f32.xlu2 %v615_v60  ;;  %622 = vmax.xlane.f32.xlu1 %v621_v63  ;;  %v256_v60 = vmax.f32 %v240_v1, %v2057_v17  ;;  %v287_v2 = vmax.f32 %v271_v43, %v2075_v24  ;;  %v286_v17 = vmax.f32 %v270_v20, %v2073_v23  ;;  %v3146_v20 = vld [vmem:[#allocation3_spill] sm:$0xff] }
 0x15c   : > { %619 = vmax.xlane.f32.xlu0 %v618_v59  ;;  %v649_v24 = vsel %vm647_vm9, %v644_v48, %v474_v37 }
 0x15d   : > { %v272_v11 = vmax.f32 %v256_v60, %v2069_v21  ;;  %v303_v16 = vmax.f32 %v287_v2, %v2095_v34  ;;  %v273_v21 = vmax.f32 %v257_v42, %v2077_v25  ;;  %v636_v25 = vsel %vm533_vm7, %v1989_v7, -inf }
 0x15e   : > { %v487_v9 = vpop.xlane.xlu2 %486  ;;  %v2303_v35 = vpop.xlane.xlu1 %492  ;;  %v1849_v60 = vmov 1  }
 0x15f   : > { %v2308_v62 = vpop.xlane.xlu0 %489  ;;  %v288_v14 = vmax.f32 %v272_v11, %v2083_v28  ;;  %v319_v22 = vmax.f32 %v303_v16, %v2105_v39  ;;  %v654_v34 = vsel %vm652_vm11, %v649_v24, %v487_v9  ;;  %v302_v28 = vmax.f32 %v286_v17, %v2081_v27  ;;  %1741 = vset.pattern.permute.xlu0 %v1849_v60  ;;  %v3148_v11 = vld [vmem:[#allocation11_spill] sm:$0xff]  ;;  %v3154_v24 = vld [vmem:[#allocation5_spill] sm:$0xff] }
 0x160   : > { %v639_v39 = vsel %vm533_vm7, %v1986_v6, -inf  ;;  %v289_v48 = vmax.f32 %v273_v21, %v2079_v26  ;;  %v643_v26 = vsel %vm642_vm8, %v2237_v29, %v2259_v55  ;;  %vm712_vm7 = vcmask 121856  }
 0x161   : > { %v304_v23 = vmax.f32 %v288_v14, %v2089_v31  ;;  %v1848_v31 = vmov 0   ;;  %v318_v37 = vmax.f32 %v302_v28, %v2109_v41  ;;  %v323_v27 = vmax.f32 %v319_v22, %v1977_v5  ;;  %v3157_v28 = vld [vmem:[#allocation22_spill] sm:$0xff] }
 0x162   : > { %1738 = vset.pattern.permute.xlu1 %v1848_v31  ;;  %1737 = vset.pattern.permute.xlu2 %v1848_v31  ;;  %v305_v3 = vmax.f32 %v289_v48, %v2093_v33  ;;  %v648_v12 = vsel %vm647_vm9, %v643_v26, %v2272_v49 }
 0x163   : > { %625 = vmax.xlane.f32.xlu2 %v624_v0  ;;  %631 = vmax.xlane.f32.xlu1 %v630_v10  ;;  %v320_v50 = vmax.f32 %v304_v23, %v2107_v40  ;;  %v343_v41 = vmax.f32 %v323_v27, %v2119_v46  ;;  %v322_v5 = vmax.f32 %v318_v37, %v1974_v4  ;;  %v3155_v23 = vld [vmem:[#allocation7_spill] sm:$0xff]  ;;  %v3158_v37 = vld [vmem:[#allocation6_spill] sm:$0xff] }
 0x164   : > { %628 = vmax.xlane.f32.xlu0 %v627_v19  ;;  %v653_v40 = vsel %vm652_vm11, %v648_v12, %v2284_v38  ;;  %v321_v49 = vmax.f32 %v305_v3, %v2121_v47  ;;  %v3160_v3 = vld [vmem:[#allocation16_spill] sm:$0xff] }
 0x165   : > { %v324_v13 = vmax.f32 %v320_v50, %v1989_v7  ;;  %v342_v33 = vmax.f32 %v322_v5, %v2117_v45  ;;  %v359_v46 = vmax.f32 %v343_v41, %v2149_v61  ;;  %v646_v45 = vsel %vm642_vm8, %v2249_v54, %v2270_v30  ;;  %v3147_v54 = vld [vmem:[#allocation4_spill] sm:$0xff]  ;;  %v3159_v50 = vld [vmem:[#allocation14_spill] sm:$0xff] }
 0x166   : > { %v497_v56 = vpop.xlane.xlu2 %496  ;;  %v2327_v43 = vpop.xlane.xlu1 %502  ;;  %v325_v8 = vmax.f32 %v321_v49, %v1986_v6  ;;  %v651_v47 = vsel %vm647_vm9, %v646_v45, %v2286_v57  ;;  %v3163_v49 = vld [vmem:[#allocation10_spill] sm:$0xff] }
 0x167   : > { %v500_v63 = vpop.xlane.xlu0 %499  ;;  %v658_v29 = vsel %vm657_vm10, %v653_v40, %v497_v56  ;;  %v344_v38 = vmax.f32 %v324_v13, %v2133_v53  ;;  %v375_v0 = vmax.f32 %v359_v46, %v2159_v32  ;;  %v358_v7 = vmax.f32 %v342_v33, %v2131_v52  ;;  %v3152_v56 = vld [vmem:[#allocation21_spill] sm:$0xff] }
 0x168   : > { %v2336_v59 = vsel %vm657_vm10, %v654_v34, %v500_v63  ;;  %v345_v15 = vmax.f32 %v325_v8, %v2129_v51  ;;  %v656_v52 = vsel %vm652_vm11, %v651_v47, %v2303_v35  ;;  %v3149_v51 = vld [vmem:[#allocation2_spill] sm:$0xff]  ;;  %v3153_v35 = vld [vmem:[#allocation20_spill] sm:$0xff]  ;;  %v3156_v63 = vld [vmem:[#allocation9_spill] sm:$0xff] }
 0x169   : > { %v360_v10 = vmax.f32 %v344_v38, %v2143_v58  ;;  %v374_v53 = vmax.f32 %v358_v7, %v2163_v36  ;;  %v391_v32 = vmax.f32 %v375_v0, %v2173_v44  ;;  %v3150_v36 = vld [vmem:[#allocation8_spill] sm:$0xff]  ;;  %v645_v22 = vsel %vm642_vm8, %v3153_v35, %v3152_v56  ;;  %v3161_v13 = vld [vmem:[#allocation13_spill] sm:$0xff]  ;;  %v3164_v38 = vld [vmem:[#allocation19_spill] sm:$0xff] }
 0x16a   : > { %v361_v16 = vmax.f32 %v345_v15, %v3149_v51  ;;  %v3151_v44 = vld [vmem:[#allocation12_spill] sm:$0xff]  ;;  %vm765_vm8 = vcmask 261120  }
 0x16b   : > { %634 = vmax.xlane.f32.xlu2 %v633_v18  ;;  %640 = vmax.xlane.f32.xlu1 %v639_v39  ;;  %v376_v2 = vmax.f32 %v360_v10, %v3146_v20  ;;  %v390_v30 = vmax.f32 %v374_v53, %v3147_v54  ;;  %v407_v57 = vmax.f32 %v391_v32, %v3148_v11  ;;  %v3166_v10 = vld [vmem:[#allocation18_spill] sm:$0xff] }
 0x16c   : > { %637 = vmax.xlane.f32.xlu0 %v636_v25  ;;  %v377_v21 = vmax.f32 %v361_v16, %v3154_v24  ;;  %v650_v39 = vsel %vm647_vm9, %v645_v22, %v3157_v28  ;;  %v737_v32 = vld [vmem:[%s3121_s1] sm:$0xff]  ;;  %vm812_vm9 = vcmask 1040384  }
 0x16d   : > { %v392_v42 = vmax.f32 %v376_v2, %v3150_v36  ;;  %v423_v14 = vmax.f32 %v407_v57, %v3151_v44  ;;  %v406_v34 = vmax.f32 %v390_v30, %v3155_v23  ;;  %v655_v48 = vsel %vm652_vm11, %v650_v39, %v2308_v62  ;;  %v820_v57 = vld [vmem:[%s3122_s2 + $0x8] sm:$0xff]  ;;  %v819_v24 = vld [vmem:[%s3122_s2] sm:$0xff] }
 0x16e   : > { %v506_v1 = vpop.xlane.xlu2 %505  ;;  %v513_v9 = vpop.xlane.xlu1 %512  ;;  %v393_v27 = vmax.f32 %v377_v21, %v3158_v37 }
 0x16f   : > { %v510_v55 = vpop.xlane.xlu0 %509  ;;  %v661_v58 = vsel %vm657_vm10, %v656_v52, %v506_v1  ;;  %v408_v18 = vmax.f32 %v392_v42, %v3156_v63  ;;  %v422_v26 = vmax.f32 %v406_v34, %v3159_v50  ;;  %v439_v12 = vmax.f32 %v423_v14, %v3160_v3  ;;  %v739_v42 = vld [vmem:[%s3121_s1 + $0x10] sm:$0xff]  ;;  %v852_v34 = vld [vmem:[%s3123_s3] sm:$0xff] }
 0x170   : > { %v2365_v4 = vsel %vm662_vm12, %v658_v29, %v510_v55  ;;  %v660_v1 = vsel %vm657_vm10, %v655_v48, %v2327_v43  ;;  %v3162_v55 = vld [vmem:[#allocation15_spill] sm:$0xff]  ;;  %v409_v46 = vmax.f32 %v393_v27, %v3163_v49  ;;  %v3165_v43 = vld [vmem:[#allocation17_spill] sm:$0xff]  ;;  %v664_v47 = vsel %vm662_vm12, %v2336_v59, %v513_v9  ;;  %v821_v48 = vld [vmem:[%s3122_s2 + $0x10] sm:$0xff] }
 0x171   : > { %v424_v29 = vmax.f32 %v408_v18, %v3161_v13  ;;  %v438_v33 = vmax.f32 %v422_v26, %v3162_v55  ;;  %v740_v59 = vld [vmem:[%s3121_s1 + $0x18] sm:$0xff] }
 0x172   : > { %v425_v7 = vmax.f32 %v409_v46, %v3165_v43 }
 0x173   : > { %v440_v0 = vmax.f32 %v424_v29, %v3164_v38 }
 0x174   : > { %v441_v45 = vmax.f32 %v425_v7, %v3166_v10 }
 0x176   : > { %v516_v61 = vpop.xlane.xlu2 %515  ;;  %v523_v6 = vpop.xlane.xlu1 %522 }
 0x177   : > { %v519_v19 = vpop.xlane.xlu0 %518  ;;  %v665_v5 = vsel %vm662_vm12, %v660_v1, %v516_v61  ;;  %v668_v9 = vsel %vm667_vm13, %v2365_v4, %v523_v6 }
 0x178   : > { %v666_v17 = vsel %vm662_vm12, %v661_v58, %v519_v19  ;;  %v738_v58 = vld [vmem:[%s3121_s1 + $0x8] sm:$0xff] }
 0x17e   : > { %v526_v25 = vpop.xlane.xlu2 %525  ;;  %v532_v41 = vpop.xlane.xlu1 %531 }
 0x17f   : > { %v529_v40 = vpop.xlane.xlu0 %528  ;;  %v669_v15 = vsel %vm667_vm13, %v664_v47, %v526_v25  ;;  %v671_v51 = vsel %vm667_vm13, %v666_v17, %v532_v41  ;;  %v822_v25 = vld [vmem:[%s3122_s2 + $0x18] sm:$0xff]  ;;  %v2477_v41 = vld [vmem:[%s3123_s3 + $0x10] sm:$0xff] }
 0x180   : > { %v670_v62 = vsel %vm667_vm13, %v665_v5, %v529_v40  ;;  %723 = vrot.lane.b32.xlu0 %v439_v12, %s1847_s27  ;;  %v853_v12 = vld [vmem:[%s3123_s3 + $0x8] sm:$0xff] }
 0x183   : > { %721 = vrot.lane.b32.xlu2 %v438_v33, %s1847_s27  ;;  %v855_v33 = vld [vmem:[%s3123_s3 + $0x18] sm:$0xff] }
 0x184   : > { %725 = vrot.lane.b32.xlu1 %v440_v0, %s1847_s27 }
 0x186   : > { %v536_v8 = vpop.xlane.xlu2 %535  ;;  %v542_v61 = vpop.xlane.xlu1 %541 }
 0x187   : > { %v539_v53 = vpop.xlane.xlu0 %538  ;;  %v673_v2 = vsel %vm672_vm14, %v668_v9, %v536_v8  ;;  %v675_v14 = vsel %vm672_vm14, %v670_v62, %v542_v61 }
 0x188   : > { %v674_v52 = vsel %vm672_vm14, %v669_v15, %v539_v53  ;;  %727 = vrot.lane.b32.xlu0 %v441_v45, %s1847_s27 }
 0x18b   : > { %743 = vperm.xlu2 %1737, %v737_v32  }
 0x18c   : > { %748 = vperm.xlu1 %1738, %v738_v58  }
 0x18e   : > { %v545_v19 = vpop.xlane.xlu2 %544  ;;  %v551_v20 = vpop.xlane.xlu1 %550 }
 0x18f   : > { %v548_v54 = vpop.xlane.xlu0 %547  ;;  %v676_v4 = vsel %vm672_vm14, %v671_v51, %v545_v19  ;;  %v679_v23 = vsel %vm677_vm15, %v674_v52, %v551_v20 }
 0x190   : > { %v678_v30 = vsel %vm677_vm15, %v673_v2, %v548_v54  ;;  %792 = vperm.xlu0 %1741, %v740_v59  }
 0x193   : > { %758 = vperm.xlu2 %1737, %v740_v59  }
 0x194   : > { %1739 = vset.pattern.permute.xlu1 %v1849_v60 }
 0x195   : > { %780 = vperm.xlu1 %1739, %v737_v32  }
 0x196   : > { %v554_v11 = vpop.xlane.xlu2 %553  ;;  %v560_v16 = vpop.xlane.xlu1 %559 }
 0x197   : > { %v557_v6 = vpop.xlane.xlu0 %556  ;;  %v680_v17 = vsel %vm677_vm15, %v675_v14, %v554_v11  ;;  %v683_v27 = vsel %vm682_vm1, %v678_v30, %v560_v16 }
 0x198   : > { %v681_v36 = vsel %vm677_vm15, %v676_v4, %v557_v6  ;;  %889 = vperm.xlu0 %1741, %v820_v57  }
 0x19b   : > { %1740 = vset.pattern.permute.xlu2 %v1849_v60 }
 0x19c   : > { %784 = vperm.xlu2 %1740, %v738_v58  }
 0x19d   : > { %788 = vperm.xlu1 %1739, %v739_v42  }
 0x19e   : > { %v563_v44 = vpop.xlane.xlu2 %562  ;;  %v569_v56 = vpop.xlane.xlu1 %568 }
 0x19f   : > { %v566_v35 = vpop.xlane.xlu0 %565  ;;  %v684_v63 = vsel %vm682_vm1, %v679_v23, %v563_v44  ;;  %v686_v40 = vsel %vm682_vm1, %v681_v36, %v569_v56 }
 0x1a0   : > { %v685_v22 = vsel %vm682_vm1, %v680_v17, %v566_v35  ;;  %1745 = vset.pattern.permute.xlu0 %v1848_v31 }
 0x1a1   : > { %753 = vperm.xlu0 %1745, %v739_v42  }
 0x1a4   : > { %1742 = vset.pattern.permute.xlu2 %v1848_v31 }
 0x1a5   : > { %825 = vperm.xlu2 %1742, %v819_v24   ;;  %1743 = vset.pattern.permute.xlu1 %v1848_v31 }
 0x1a6   : > { %v572_v21 = vpop.xlane.xlu2 %571  ;;  %830 = vperm.xlu1 %1743, %v820_v57   ;;  %v578_v28 = vpop.xlane.xlu1 %577 }
 0x1a7   : > { %v575_v18 = vpop.xlane.xlu0 %574  ;;  %v688_v50 = vsel %vm687_vm2, %v683_v27, %v572_v21  ;;  %v690_v46 = vsel %vm687_vm2, %v685_v22, %v578_v28 }
 0x1a8   : > { %v2460_v39 = vsel %vm687_vm2, %v684_v63, %v575_v18 }
 0x1a9   : > { %858 = vperm.xlu0 %1745, %v852_v34  }
 0x1ad   : > { %835 = vperm.xlu2 %1742, %v821_v48  }
 0x1ae   : > { %v581_v37 = vpop.xlane.xlu2 %580  ;;  %840 = vperm.xlu1 %1743, %v822_v25   ;;  %v587_v1 = vpop.xlane.xlu1 %586 }
 0x1af   : > { %v584_v26 = vpop.xlane.xlu0 %583  ;;  %v691_v13 = vsel %vm687_vm2, %v686_v40, %v581_v37  ;;  %v694_v57 = vsel %vm692_vm3, %v2460_v39, %v587_v1 }
 0x1b0   : > { %v693_v3 = vsel %vm692_vm3, %v688_v50, %v584_v26 }
 0x1b5   : > { %863 = vperm.xlu2 %1742, %v853_v12  }
 0x1b6   : > { %v590_v5 = vpop.xlane.xlu2 %589  ;;  %868 = vperm.xlu1 %1743, %v2477_v41   ;;  %v596_v62 = vpop.xlane.xlu1 %595 }
 0x1b7   : > { %v593_v29 = vpop.xlane.xlu0 %592  ;;  %v695_v38 = vsel %vm692_vm3, %v690_v46, %v590_v5  ;;  %v698_v11 = vsel %vm697_vm4, %v693_v3, %v596_v62 }
 0x1b8   : > { %v2483_v55 = vsel %vm692_vm3, %v691_v13, %v593_v29 }
 0x1bd   : > { %873 = vperm.xlu2 %1742, %v855_v33  }
 0x1be   : > { %v599_v49 = vpop.xlane.xlu2 %598  ;;  %1744 = vset.pattern.permute.xlu1 %v1849_v60  ;;  %v605_v8 = vpop.xlane.xlu1 %604 }
 0x1bf   : > { %v602_v0 = vpop.xlane.xlu0 %601  ;;  %885 = vperm.xlu1 %1744, %v819_v24   ;;  %v701_v50 = vsel %vm697_vm4, %v2483_v55, %v605_v8 }
 0x1c0   : > { %v700_v43 = vsel %vm697_vm4, %v695_v38, %v602_v0 }
 0x1c5   : > { %1746 = vset.pattern.permute.xlu2 %v1849_v60 }
 0x1c6   : > { %v608_v7 = vpop.xlane.xlu2 %607  ;;  %893 = vperm.xlu2 %1746, %v821_v48   ;;  %v614_v47 = vpop.xlane.xlu1 %613 }
 0x1c7   : > { %897 = vperm.xlu1 %1744, %v822_v25   ;;  %v611_v10 = vpop.xlane.xlu0 %610  ;;  %v703_v51 = vsel %vm702_vm5, %v698_v11, %v608_v7  ;;  %v705_v3 = vsel %vm702_vm5, %v700_v43, %v614_v47 }
 0x1ce   : > { %v617_v45 = vpop.xlane.xlu2 %616  ;;  %910 = vperm.xlu2 %1746, %v852_v34   ;;  %v623_v53 = vpop.xlane.xlu1 %622 }
 0x1cf   : > { %914 = vperm.xlu1 %1744, %v853_v12   ;;  %v620_v15 = vpop.xlane.xlu0 %619  ;;  %v706_v12 = vsel %vm702_vm5, %v701_v50, %v617_v45 }
 0x1d0   : > { %v708_v16 = vsel %vm707_vm6, %v703_v51, %v620_v15 }
 0x1d6   : > { %v626_v61 = vpop.xlane.xlu2 %625  ;;  %922 = vperm.xlu2 %1746, %v855_v33   ;;  %v632_v58 = vpop.xlane.xlu1 %631 }
 0x1d7   : > { %1747 = vset.pattern.permute.xlu1 %v1848_v31  ;;  %v629_v52 = vpop.xlane.xlu0 %628  ;;  %v713_v36 = vsel %vm712_vm7, %v708_v16, %v632_v58  ;;  %v710_v1 = vsel %vm707_vm6, %v705_v3, %v626_v61 }
 0x1d8   : > { %v711_v5 = vsel %vm707_vm6, %v706_v12, %v629_v52 }
 0x1de   : > { %v635_v32 = vpop.xlane.xlu2 %634  ;;  %1749 = vset.pattern.permute.xlu2 %v1848_v31  ;;  %v641_v20 = vpop.xlane.xlu1 %640  ;;  %v699_v31 = vsel %vm697_vm4, %v694_v57, %v599_v49 }
 0x1df   : > { %v638_v59 = vpop.xlane.xlu0 %637  ;;  %v704_v6 = vsel %vm702_vm5, %v699_v31, %v611_v10  ;;  %v716_v13 = vsel %vm712_vm7, %v711_v5, %v641_v20 }
 0x1e0   : > { %v709_v42 = vsel %vm707_vm6, %v704_v6, %v623_v53  ;;  %v715_v29 = vsel %vm712_vm7, %v710_v1, %v638_v59 }
 0x1e1   : > { %v714_v14 = vsel %vm712_vm7, %v709_v42, %v635_v32 }
 0x1e6   : > { %v722_v19 = vpop.permute.xlu2 %721 }
 0x1e7   : > { %v733_v44 = vsel %vm442_vm0, %v713_v36, %v722_v19 }
 0x1ee   : > { %v744_v9 = vpop.permute.xlu2 %743 }
 0x1ef   : > { %v761_v56 = vmul.f32 %v744_v9, %v733_v44 }
 0x1f1   : > { %v766_v21 = vsel %vm765_vm8, %v761_v56, 0.0 }
 0x1f2   : > { %v724_v2 = vpop.permute.xlu0 %723 }
 0x1f3   : > { %v734_v35 = vsel %vm442_vm0, %v714_v14, %v724_v2 }
 0x1f6   : > { %v759_v54 = vpop.permute.xlu2 %758  ;;  %v726_v30 = vpop.permute.xlu1 %725 }
 0x1f7   : > { %v735_v49 = vsel %vm442_vm0, %v715_v29, %v726_v30 }
 0x1fa   : > { %v728_v4 = vpop.permute.xlu0 %727 }
 0x1fb   : > { %v736_v33 = vsel %vm442_vm0, %v716_v13, %v728_v4 }
 0x1fc   : > { %v764_v7 = vmul.f32 %v759_v54, %v736_v33 }
 0x1fe   : > { %v785_v17 = vpop.permute.xlu2 %784  ;;  %v749_v22 = vpop.permute.xlu1 %748  ;;  %v771_v32 = vsel %vm765_vm8, %v764_v7, 0.0 }
 0x1ff   : > { %v762_v24 = vmul.f32 %v749_v22, %v734_v35  ;;  %v796_v28 = vmul.f32 %v785_v17, %v734_v35 }
 0x201   : > { %v767_v23 = vsel %vm765_vm8, %v762_v24, 0.0  ;;  %v800_v25 = vsel %vm765_vm8, %v796_v28, 0.0 }
 0x202   : > { %v768_v34 = vadd.f32 %v767_v23, %v766_v21  ;;  %v793_v63 = vpop.permute.xlu0 %792 }
 0x203   : > { %v798_v55 = vmul.f32 %v793_v63, %v736_v33 }
 0x205   : > { %v804_v8 = vsel %vm765_vm8, %v798_v55, 0.0 }
 0x206   : > { %v2509_v18 = vpop.permute.xlu2 %825 }
 0x207   : > { %v781_v39 = vpop.permute.xlu1 %780 }
 0x208   : > { %v795_v48 = vmul.f32 %v781_v39, %v733_v44 }
 0x20a   : > { %v799_v37 = vsel %vm765_vm8, %v795_v48, 0.0  ;;  %v890_v27 = vpop.permute.xlu0 %889 }
 0x20b   : > { %v801_v26 = vadd.f32 %v800_v25, %v799_v37 }
 0x20e   : > { %v836_v40 = vpop.permute.xlu2 %835 }
 0x20f   : > { %v789_v62 = vpop.permute.xlu1 %788 }
 0x210   : > { %v797_v46 = vmul.f32 %v789_v62, %v735_v49 }
 0x212   : > { %v802_v38 = vsel %vm765_vm8, %v797_v46, 0.0 }
 0x213   : > { %v803_v0 = vadd.f32 %v802_v38, %v801_v26  ;;  %v754_v43 = vpop.permute.xlu0 %753 }
 0x214   : > { %v763_v10 = vmul.f32 %v754_v43, %v735_v49 }
 0x215   : > { %v805_v45 = vadd.f32 %v804_v8, %v803_v0 }
 0x216   : > { %v2525_v47 = vpop.permute.xlu2 %863  ;;  %v769_v61 = vsel %vm765_vm8, %v763_v10, 0.0 }
 0x217   : > { %v806_v15 = vrot.slane %v805_v45, 4  ;;  %v770_v53 = vadd.f32 %v769_v61, %v768_v34 }
 0x218   : > { %v831_v52 = vpop.permute.xlu1 %830 }
 0x219   : > { %v807_v58 = vadd.f32 %v806_v15, %v805_v45  ;;  %v772_v19 = vadd.f32 %v771_v32, %v770_v53 }
 0x21b   : > { %v808_v59 = vrot.slane %v807_v58, 2  ;;  %v773_v9 = vrot.slane %v772_v19, 4  ;;  %v859_v34 = vpop.permute.xlu0 %858 }
 0x21d   : > { %v809_v20 = vadd.f32 %v808_v59, %v807_v58  ;;  %v774_v2 = vadd.f32 %v773_v9, %v772_v19 }
 0x21e   : > { %v874_v54 = vpop.permute.xlu2 %873 }
 0x21f   : > { %v775_v30 = vrot.slane %v774_v2, 2  ;;  %v810_v57 = vrot.slane %v809_v20, 1 }
 0x220   : > { %v841_v11 = vpop.permute.xlu1 %840 }
 0x221   : > { %v776_v51 = vadd.f32 %v775_v30, %v774_v2  ;;  %v811_v16 = vadd.f32 %v810_v57, %v809_v20 }
 0x223   : > { %v777_v31 = vrot.slane %v776_v51, 1 }
 0x225   : > { %v778_v4 = vadd.f32 %v777_v31, %v776_v51 }
 0x226   : > { %v894_v6 = vpop.permute.xlu2 %893 }
 0x227   : > { %v813_v36 = vsel %vm812_vm9, %v778_v4, %v811_v16 }
 0x228   : > { %v814_v42 = vadd.f32 3.0, %v813_v36  ;;  %v869_v44 = vpop.permute.xlu1 %868 }
 0x22a   : > { %v815_v14 = vmax.f32 %v814_v42, 0.0 }
 0x22c   : > { %v816_v56 = vmin.f32 %v815_v14, 6.0 }
 0x22e   : > { %v911_v17 = vpop.permute.xlu2 %910  ;;  %v817_v35 = vmul.f32 0.16666667, %v816_v56 }
 0x230   : > { %v818_v22 = vmul.f32 %v817_v35, %v813_v36 }
 0x231   : > { %v886_v24 = vpop.permute.xlu1 %885 }
 0x232   : > { %v843_v21 = vperm.slane %v818_v22, 0  ;;  %v2529_v23 = vperm.slane %v818_v22, 1 }
 0x234   : > { %v845_v63 = vmul.f32 %v843_v21, %v831_v52  ;;  %v902_v28 = vmul.f32 %v2529_v23, %v890_v27  ;;  %v876_v39 = vmul.f32 %v859_v34, %v843_v21  ;;  %v846_v48 = vmul.f32 %v843_v21, %v836_v40 }
 0x235   : > { %v903_v25 = vmul.f32 %v2529_v23, %v894_v6  ;;  %v2533_v26 = vmul.f32 %v869_v44, %v843_v21  ;;  %v925_v3 = vmul.f32 %v911_v17, %v2529_v23  ;;  %v844_v12 = vmul.f32 %v843_v21, %v2509_v18 }
 0x236   : > { %v923_v37 = vpop.permute.xlu2 %922  ;;  %v906_v50 = vadd.f32 %v902_v28, %v845_v63  ;;  %v879_v1 = vmul.f32 %v874_v54, %v843_v21  ;;  %v901_v13 = vmul.f32 %v2529_v23, %v886_v24  ;;  %v847_v46 = vmul.f32 %v843_v21, %v841_v11 }
 0x237   : > { %v907_v5 = vadd.f32 %v903_v25, %v846_v48  ;;  %v928_v29 = vmul.f32 %v923_v37, %v2529_v23  ;;  %v929_v27 = vadd.f32 %v925_v3, %v876_v39  ;;  %v877_v54 = vmul.f32 %v2525_v47, %v843_v21 }
 0x238   : > { %v1695_v33 = vmul.f32 -1.442695, %v906_v50  ;;  %v905_v40 = vadd.f32 %v901_v13, %v844_v12  ;;  %v1854_v48 = vmov 6  }
 0x239   : > { %v1696_v62 = vmul.f32 -1.442695, %v907_v5  ;;  %v932_v49 = vadd.f32 %v928_v29, %v879_v1  ;;  %v898_v55 = vpop.permute.xlu1 %897  ;;  %v1698_v38 = vmul.f32 -1.442695, %v929_v27 }
 0x23a   : > { %1793 = vpow2.f32 %v1695_v33  ;;  %v904_v0 = vmul.f32 %v2529_v23, %v898_v55  ;;  %v1694_v43 = vmul.f32 -1.442695, %v905_v40 }
 0x23b   : > { %1795 = vpow2.f32 %v1696_v62  ;;  %v1701_v18 = vmul.f32 -1.442695, %v932_v49 }
 0x23c   : > { %1797 = vpow2.f32 %v1698_v38  ;;  %v908_v7 = vadd.f32 %v904_v0, %v847_v46 }
 0x23d   : > { %1799 = vpow2.f32 %v1694_v43 }
 0x23e   : > { %1801 = vpow2.f32 %v1701_v18  ;;  %v1697_v8 = vmul.f32 -1.442695, %v908_v7 }
 0x240   : > { %v1794_v10 = vpop.eup %1793  ;;  %1803 = vpow2.f32 %v1697_v8 }
 0x241   : > { %v1796_v45 = vpop.eup %1795  ;;  %v946_v61 = vadd.f32 1.0, %v1794_v10  ;;  %v915_v52 = vpop.permute.xlu1 %914 }
 0x242   : > { %v1798_v15 = vpop.eup %1797  ;;  %v947_v53 = vadd.f32 1.0, %v1796_v45  ;;  %v926_v20 = vmul.f32 %v915_v52, %v2529_v23 }
 0x243   : > { %v1800_v32 = vpop.eup %1799  ;;  %1805 = vrcp.f32 %v946_v61  ;;  %v2540_v19 = vadd.f32 1.0, %v1798_v15  ;;  %v973_v11 = vand.u32 2147483647, %v946_v61  ;;  %vm969_vm10 = vweird.f32 %v946_v61 }
 0x244   : > { %v1802_v58 = vpop.eup %1801  ;;  %1807 = vrcp.f32 %v947_v53  ;;  %v2542_v59 = vadd.f32 1.0, %v1800_v32  ;;  %v930_v31 = vadd.f32 %v926_v20, %v877_v54  ;;  %v975_v16 = vand.u32 2147483648, %v946_v61 }
 0x245   : > { %v2544_v9 = vadd.f32 1.0, %v1802_v58  ;;  %1809 = vrcp.f32 %v2540_v19  ;;  %vm984_vm11 = vweird.f32 %v947_v53  ;;  %v988_v36 = vand.u32 2147483647, %v947_v53 }
 0x246   : > { %v1804_v2 = vpop.eup %1803  ;;  %1811 = vrcp.f32 %v2542_v59  ;;  %vm2555_vm13 = vcmp.eq.f32.partialorder %v973_v11, 8.507059e+37  ;;  %v990_v56 = vand.u32 2147483648, %v947_v53  ;;  %v1699_v24 = vmul.f32 -1.442695, %v930_v31 }
 0x247   : > { %1813 = vrcp.f32 %v2544_v9  ;;  %v2551_v42 = vadd.f32 1.0, %v1804_v2  ;;  %v976_v34 = vor.u32 1.1754944e-38, %v975_v16  ;;  %vm2565_vm15 = vcmp.eq.f32.partialorder %v988_v36, 8.507059e+37 }
 0x248   : > { %v991_v3 = vor.u32 1.1754944e-38, %v990_v56  ;;  %v958_v1 = vand.u32 2147483647, %v2542_v59  ;;  %v960_v29 = vand.u32 2147483648, %v2542_v59  ;;  %vm954_vm4 = vweird.f32 %v2542_v59 }
 0x249   : > { %v1806_v30 = vpop.eup %1805  ;;  %1815 = vrcp.f32 %v2551_v42  ;;  %vm1030_vm6 = vweird.f32 %v2540_v19  ;;  %v1036_v43 = vand.u32 2147483648, %v2540_v19  ;;  %v1034_v7 = vand.u32 2147483647, %v2540_v19 }
 0x24a   : > { %v1808_v57 = vpop.eup %1807  ;;  %v965_v51 = vmul.f32 %v1806_v30, %v946_v61  ;;  %vm970_vm12 = vweird.f32 %v1806_v30  ;;  %1817 = vpow2.f32 %v1699_v24  ;;  %v961_v18 = vor.u32 1.1754944e-38, %v960_v29 }
 0x24b   : > { %v980_v4 = vmul.f32 %v1808_v57, %v947_v53  ;;  %v2553_v44 = vpop.eup %1809  ;;  %vm985_vm14 = vweird.f32 %v1808_v57  ;;  %vm971_vm1 = vmor %vm969_vm10, %vm970_vm12  ;;  %vm959_vm9 = vcmp.eq.f32.partialorder %v958_v1, 8.507059e+37  ;;  %v1003_v32 = vand.u32 2147483647, %v2551_v42 }
 0x24c   : > { %v966_v6 = vsub.f32 1.0, %v965_v51  ;;  %v1812_v17 = vpop.eup %1811  ;;  %v1026_v22 = vmul.f32 %v2553_v44, %v2540_v19  ;;  %vm986_vm2 = vmor %vm984_vm11, %vm985_vm14  ;;  %vm1031_vm5 = vweird.f32 %v2553_v44  ;;  %v1005_v52 = vand.u32 2147483648, %v2551_v42 }
 0x24d   : > { %v981_v14 = vsub.f32 1.0, %v980_v4  ;;  %v2562_v21 = vpop.eup %1813  ;;  %v950_v28 = vmul.f32 %v1812_v17, %v2542_v59  ;;  %vm955_vm3 = vweird.f32 %v1812_v17  ;;  %vm2594_vm10 = vmor %vm1030_vm6, %vm1031_vm5  ;;  %v1037_v20 = vor.u32 1.1754944e-38, %v1036_v43 }
 0x24e   : > { %v967_v35 = vmul.f32 %v1806_v30, %v966_v6  ;;  %v1027_v25 = vsub.f32 1.0, %v1026_v22  ;;  %v1071_v37 = vmul.f32 %v2562_v21, %v2544_v9  ;;  %vm956_vm7 = vmor %vm954_vm4, %vm955_vm3  ;;  %vm1035_vm12 = vcmp.eq.f32.partialorder %v1034_v7, 8.507059e+37 }
 0x24f   : > { %v982_v63 = vmul.f32 %v1808_v57, %v981_v14  ;;  %v951_v12 = vsub.f32 1.0, %v950_v28  ;;  %v1816_v40 = vpop.eup %1815  ;;  %v1006_v54 = vor.u32 1.1754944e-38, %v1005_v52  ;;  %v1081_v51 = vand.u32 2147483648, %v2544_v9 }
 0x250   : > { %v968_v39 = vadd.f32 %v1806_v30, %v967_v35  ;;  %v1028_v13 = vmul.f32 %v2553_v44, %v1027_v25  ;;  %v1072_v55 = vsub.f32 1.0, %v1071_v37  ;;  %v995_v0 = vmul.f32 %v1816_v40, %v2551_v42  ;;  %v1818_v45 = vpop.eup %1817 }
 0x251   : > { %v983_v50 = vadd.f32 %v1808_v57, %v982_v63  ;;  %v952_v62 = vmul.f32 %v1812_v17, %v951_v12  ;;  %vm1000_vm11 = vweird.f32 %v1816_v40  ;;  %v1022_v59 = vadd.f32 1.0, %v1818_v45 }
 0x252   : > { %v972_v5 = vsel %vm971_vm1, %v1806_v30, %v968_v39  ;;  %v1029_v46 = vadd.f32 %v2553_v44, %v1028_v13  ;;  %v996_v10 = vsub.f32 1.0, %v995_v0  ;;  %v1073_v53 = vmul.f32 %v2562_v21, %v1072_v55 }
 0x253   : > { %v2579_v33 = vsel %vm2555_vm13, %v976_v34, %v972_v5  ;;  %v987_v27 = vsel %vm986_vm2, %v1808_v57, %v983_v50  ;;  %v953_v38 = vadd.f32 %v1812_v17, %v952_v62  ;;  %vm999_vm13 = vweird.f32 %v2551_v42 }
 0x254   : > { %v2583_v49 = vsel %vm2565_vm15, %v991_v3, %v987_v27  ;;  %1092 = vperm.xlu0 %1745, %v2579_v33   ;;  %v1033_v58 = vsel %vm2594_vm10, %v2553_v44, %v1029_v46  ;;  %v997_v19 = vmul.f32 %v1816_v40, %v996_v10  ;;  %1819 = vrcp.f32 %v1022_v59  ;;  %vm1001_vm14 = vmor %vm999_vm13, %vm1000_vm11 }
 0x255   : > { %1097 = vperm.xlu2 %1749, %v2583_v49   ;;  %v957_v8 = vsel %vm956_vm7, %v1812_v17, %v953_v38  ;;  %v2609_v30 = vsel %vm1035_vm12, %v1037_v20, %v1033_v58  ;;  %v1074_v11 = vadd.f32 %v2562_v21, %v1073_v53  ;;  %vm1076_vm15 = vweird.f32 %v2562_v21  ;;  %v2688_v53 = vld [vmem:[%s1905_s20 + $0x30] sm:$0xff] }
 0x256   : > { %v2598_v15 = vsel %vm959_vm9, %v961_v18, %v957_v8  ;;  %v998_v2 = vadd.f32 %v1816_v40, %v997_v19  ;;  %vm1004_vm1 = vcmp.eq.f32.partialorder %v1003_v32, 8.507059e+37  ;;  %vm1075_vm2 = vweird.f32 %v2544_v9 }
 0x257   : > { %1087 = vperm.xlu1 %1747, %v2598_v15   ;;  %v1079_v16 = vand.u32 2147483647, %v2544_v9  ;;  %vm1077_vm3 = vmor %vm1075_vm2, %vm1076_vm15  ;;  %v1082_v36 = vor.u32 1.1754944e-38, %v1081_v51  ;;  %v1051_v47 = vand.u32 2147483648, %v1022_v59  ;;  %v1049_v56 = vand.u32 2147483647, %v1022_v59 }
 0x258   : > { %v1002_v57 = vsel %vm1001_vm14, %v1816_v40, %v998_v2  ;;  %v1078_v6 = vsel %vm1077_vm3, %v2562_v21, %v1074_v11  ;;  %vm1045_vm6 = vweird.f32 %v1022_v59  ;;  %v1850_v24 = vmov 2  }
 0x259   : > { %v2617_v31 = vsel %vm1004_vm1, %v1006_v54, %v1002_v57  ;;  %vm1080_vm4 = vcmp.eq.f32.partialorder %v1079_v16, 8.507059e+37  ;;  %v1052_v17 = vor.u32 1.1754944e-38, %v1051_v47  ;;  %vm1050_vm9 = vcmp.eq.f32.partialorder %v1049_v56, 8.507059e+37 }
 0x25a   : > { %v1820_v4 = vpop.eup %1819  ;;  %v2624_v44 = vsel %vm1080_vm4, %v1082_v36, %v1078_v6  ;;  %v1852_v21 = vmov 4   ;;  %v1853_v34 = vmov 5   ;;  %v1855_v38 = vmov 7  }
 0x25b   : > { %v1041_v42 = vmul.f32 %v1820_v4, %v1022_v59  ;;  %vm1046_vm5 = vweird.f32 %v1820_v4  ;;  %v1856_v36 = vmov 8   ;;  %vm1569_vm14 = vcmask 392192  }
 0x25c   : > { %1748 = vset.pattern.permute.xlu0 %v1849_v60  ;;  %vm1047_vm7 = vmor %vm1045_vm6, %vm1046_vm5  ;;  %vm1574_vm15 = vcmask 523264   ;;  %vm1579_vm1 = vcmask 654336   ;;  %vm1584_vm2 = vcmask 785408   ;;  %vm1589_vm3 = vcmask 916480  }
 0x25d   : > { %1113 = vrot.lane.b32.xlu2 %v2609_v30, %s1841_s21  ;;  %918 = vperm.xlu0 %1748, %v2477_v41   ;;  %v1042_v41 = vsub.f32 1.0, %v1041_v42 }
 0x25e   : > { %1751 = vset.pattern.permute.xlu2 %v1849_v60 }
 0x25f   : > { %1102 = vperm.xlu1 %1747, %v2617_v31   ;;  %v1043_v14 = vmul.f32 %v1820_v4, %v1042_v41 }
 0x261   : > { %v1044_v9 = vadd.f32 %v1820_v4, %v1043_v14  ;;  %v1857_v14 = vmov 9  }
 0x263   : > { %v1048_v35 = vsel %vm1047_vm7, %v1820_v4, %v1044_v9  ;;  %v1858_v9 = vmov 10  }
 0x264   : > { %v2629_v22 = vsel %vm1050_vm9, %v1052_v17, %v1048_v35  ;;  %v1859_v35 = vmov 11  }
 0x265   : > { %1119 = vrot.lane.b32.xlu2 %v2624_v44, %s1841_s21 }
 0x267   : > { %1750 = vset.pattern.permute.xlu1 %v1849_v60  ;;  %v1851_v60 = vmov 3  }
 0x268   : > { %1115 = vrot.lane.b32.xlu1 %v2629_v22, %s1841_s21 }
 0x26d   : > { %1138 = vperm.xlu2 %1751, %v2583_v49  }
 0x270   : > { %1130 = vperm.xlu1 %1750, %v2598_v15  }
 0x275   : > { %1752 = vset.pattern.permute.xlu2 %v1850_v24 }
 0x276   : > { %1154 = vperm.xlu2 %1752, %v2598_v15  }
 0x278   : > { %1142 = vperm.xlu1 %1750, %v2617_v31  }
 0x27e   : > { %1166 = vperm.xlu2 %1752, %v2617_v31  }
 0x280   : > { %1753 = vset.pattern.permute.xlu1 %v1850_v24 }
 0x281   : > { %1158 = vperm.xlu1 %1753, %v2579_v33  }
 0x286   : > { %1175 = vrot.lane.b32.xlu2 %v2629_v22, %s1847_s27 }
 0x287   : > { %1755 = vset.pattern.permute.xlu2 %v1851_v60 }
 0x289   : > { %1173 = vrot.lane.b32.xlu1 %v2609_v30, %s1847_s27 }
 0x28a   : > { %1756 = vset.pattern.permute.xlu1 %v1851_v60 }
 0x28e   : > { %1190 = vperm.xlu2 %1755, %v2598_v15  }
 0x296   : > { %1202 = vperm.xlu2 %1755, %v2617_v31  }
 0x29e   : > { %1211 = vrot.lane.b32.xlu2 %v2629_v22, %s1846_s26 }
 0x29f   : > { %1758 = vset.pattern.permute.xlu2 %v1852_v21 }
 0x2a6   : > { %1226 = vperm.xlu2 %1758, %v2598_v15  }
 0x2ae   : > { %1238 = vperm.xlu2 %1758, %v2617_v31  }
 0x2af   : > { %v2666_v50 = vpop.permute.xlu2 %1097 }
 0x2b6   : > { %1247 = vrot.lane.b32.xlu2 %v2629_v22, %s1845_s25 }
 0x2b7   : > { %1761 = vset.pattern.permute.xlu2 %v1853_v34  ;;  %v2669_v5 = vpop.permute.xlu2 %1113 }
 0x2be   : > { %1262 = vperm.xlu2 %1761, %v2598_v15  }
 0x2bf   : > { %v2680_v55 = vpop.permute.xlu2 %1119 }
 0x2c6   : > { %1274 = vperm.xlu2 %1761, %v2617_v31   ;;  %v2659_v63 = vpop.permute.xlu0 %1092 }
 0x2c7   : > { %v2699_v2 = vpop.permute.xlu2 %1138 }
 0x2c9   : > { %v1088_v28 = vpop.permute.xlu1 %1087 }
 0x2ce   : > { %1283 = vrot.lane.b32.xlu2 %v2629_v22, %s1844_s24 }
 0x2cf   : > { %v919_v39 = vpop.permute.xlu0 %918  ;;  %1764 = vset.pattern.permute.xlu2 %v1854_v48 }
 0x2d0   : > { %v927_v25 = vmul.f32 %v919_v39, %v2529_v23  ;;  %v2675_v23 = vld [vmem:[%s1905_s20] sm:$0xff]  ;;  %v1155_v16 = vpop.permute.xlu2 %1154 }
 0x2d1   : > { %v1103_v3 = vpop.permute.xlu1 %1102  ;;  %v1169_v4 = vmul.f32 %v2675_v23, %v1155_v16 }
 0x2d2   : > { %v931_v37 = vadd.f32 %v927_v25, %v2533_v26  ;;  %v1105_v26 = vmul.f32 %v2675_v23, %v1088_v28  ;;  %v1108_v32 = vmul.f32 %v2688_v53, %v1103_v3  ;;  %v1861_v28 = vmov 13  }
 0x2d3   : > { %v1862_v25 = vmov 14  }
 0x2d4   : > { %v1700_v12 = vmul.f32 -1.442695, %v931_v37  ;;  %v1125_v43 = vmul.f32 %v2669_v5, %v1105_v26  ;;  %v1128_v54 = vmul.f32 %v2680_v55, %v1108_v32  ;;  %v2806_v37 = vld [vmem:[%s1905_s20 + $0x20] sm:$0xff] }
 0x2d5   : > { %v1107_v3 = vmul.f32 %v2806_v37, %v2666_v50 }
 0x2d6   : > { %1821 = vpow2.f32 %v1700_v12  ;;  %1298 = vperm.xlu2 %1764, %v2598_v15   ;;  %v1147_v12 = vmul.f32 %v2806_v37, %v2699_v2 }
 0x2d8   : > { %v2735_v47 = vpop.permute.xlu2 %1166 }
 0x2da   : > { %v2671_v29 = vpop.permute.xlu1 %1115 }
 0x2dc   : > { %v1822_v1 = vpop.eup %1821 }
 0x2dd   : > { %v1023_v13 = vadd.f32 1.0, %v1822_v1 }
 0x2de   : > { %1310 = vperm.xlu2 %1764, %v2617_v31  }
 0x2df   : > { %1823 = vrcp.f32 %v1023_v13  ;;  %v1066_v18 = vand.u32 2147483648, %v1023_v13  ;;  %v1064_v10 = vand.u32 2147483647, %v1023_v13  ;;  %vm1060_vm11 = vweird.f32 %v1023_v13 }
 0x2e0   : > { %v2745_v56 = vpop.permute.xlu2 %1175 }
 0x2e1   : > { %v1067_v52 = vor.u32 1.1754944e-38, %v1066_v18  ;;  %vm1065_vm13 = vcmp.eq.f32.partialorder %v1064_v10, 8.507059e+37 }
 0x2e2   : > { %v1131_v40 = vpop.permute.xlu1 %1130 }
 0x2e3   : > { %v1145_v46 = vmul.f32 %v2675_v23, %v1131_v40 }
 0x2e5   : > { %v1824_v27 = vpop.eup %1823  ;;  %v1149_v7 = vmul.f32 %v1145_v46, %v2609_v30  ;;  %v2829_v46 = vld [vmem:[%s1905_s20 + $0x10] sm:$0xff] }
 0x2e6   : > { %v1056_v62 = vmul.f32 %v1824_v27, %v1023_v13  ;;  %1319 = vrot.lane.b32.xlu2 %v2629_v22, %s1843_s23  ;;  %vm1061_vm10 = vweird.f32 %v1824_v27  ;;  %v1106_v18 = vmul.f32 %v2829_v46, %v2659_v63 }
 0x2e7   : > { %1767 = vset.pattern.permute.xlu2 %v1855_v38  ;;  %v1561_v45 = vsel %vm442_vm0, %v1125_v43, %v1149_v7  ;;  %vm1062_vm12 = vmor %vm1060_vm11, %vm1061_vm10 }
 0x2e8   : > { %v1057_v0 = vsub.f32 1.0, %v1056_v62  ;;  %v2754_v17 = vpop.permute.xlu2 %1190  ;;  %v1863_v62 = vmov 15   ;;  %v1126_v10 = vmul.f32 %v2671_v29, %v1106_v18 }
 0x2ea   : > { %v1058_v8 = vmul.f32 %v1824_v27, %v1057_v0  ;;  %v1143_v19 = vpop.permute.xlu1 %1142 }
 0x2eb   : > { %v1148_v59 = vmul.f32 %v2688_v53, %v1143_v19  ;;  %v1205_v19 = vmul.f32 %v2675_v23, %v2754_v17  ;;  %v1172_v17 = vmul.f32 %v2688_v53, %v2735_v47 }
 0x2ec   : > { %v1059_v61 = vadd.f32 %v1824_v27, %v1058_v8 }
 0x2ed   : > { %v1152_v11 = vmul.f32 %v1148_v59, %v2624_v44 }
 0x2ee   : > { %v1063_v58 = vsel %vm1062_vm12, %v1824_v27, %v1059_v61  ;;  %1334 = vperm.xlu2 %1767, %v2598_v15  }
 0x2ef   : > { %v2693_v20 = vsel %vm1065_vm13, %v1067_v52, %v1063_v58  ;;  %v2704_v57 = vsel %vm442_vm0, %v1128_v54, %v1152_v11 }
 0x2f0   : > { %1117 = vrot.lane.b32.xlu0 %v2693_v20, %s1841_s21  ;;  %1177 = vrot.lane.b32.xlu1 %v2693_v20, %s1847_s27  ;;  %v1151_v26 = vmul.f32 %v1147_v12, %v2693_v20 }
 0x2f3   : > { %v2707_v51 = vpop.permute.xlu1 %1158 }
 0x2f6   : > { %1346 = vperm.xlu2 %1767, %v2617_v31  }
 0x2f8   : > { %1134 = vperm.xlu0 %1748, %v2579_v33   ;;  %1194 = vperm.xlu1 %1756, %v2579_v33  }
 0x2fb   : > { %v2714_v6 = vpop.permute.xlu1 %1173 }
 0x2fc   : > { %v1185_v42 = vmul.f32 %v2714_v6, %v1169_v4 }
 0x2fe   : > { %1355 = vrot.lane.b32.xlu2 %v2629_v22, %s1842_s22  ;;  %v2724_v41 = vsel %vm765_vm8, %v1561_v45, %v1185_v42 }
 0x2ff   : > { %1770 = vset.pattern.permute.xlu2 %v1856_v36 }
 0x300   : > { %1754 = vset.pattern.permute.xlu0 %v1850_v24  ;;  %1209 = vrot.lane.b32.xlu1 %v2609_v30, %s1846_s26  ;;  %v2765_v24 = vpop.permute.xlu2 %1202 }
 0x301   : > { %1162 = vperm.xlu0 %1754, %v2583_v49   ;;  %1759 = vset.pattern.permute.xlu1 %v1852_v21 }
 0x306   : > { %1370 = vperm.xlu2 %1770, %v2598_v15  }
 0x308   : > { %1213 = vrot.lane.b32.xlu1 %v2693_v20, %s1846_s26 }
 0x309   : > { %1179 = vrot.lane.b32.xlu0 %v2624_v44, %s1847_s27 }
 0x30a   : > { %1757 = vset.pattern.permute.xlu0 %v1851_v60  ;;  %v2773_v60 = vpop.permute.xlu2 %1211 }
 0x30e   : > { %1382 = vperm.xlu2 %1770, %v2617_v31  }
 0x310   : > { %1230 = vperm.xlu1 %1759, %v2579_v33  }
 0x311   : > { %1198 = vperm.xlu0 %1757, %v2583_v49  }
 0x316   : > { %1774 = vset.pattern.permute.xlu2 %v1857_v14 }
 0x317   : > { %1398 = vperm.xlu2 %1774, %v2579_v33  }
 0x318   : > { %1245 = vrot.lane.b32.xlu1 %v2609_v30, %s1845_s25 }
 0x319   : > { %1215 = vrot.lane.b32.xlu0 %v2624_v44, %s1846_s26  ;;  %1762 = vset.pattern.permute.xlu1 %v1853_v34 }
 0x31a   : > { %1760 = vset.pattern.permute.xlu0 %v1852_v21  ;;  %v1860_v21 = vmov 12  }
 0x31f   : > { %1776 = vset.pattern.permute.xlu2 %v1858_v9 }
 0x320   : > { %1418 = vperm.xlu2 %1776, %v2598_v15   ;;  %1249 = vrot.lane.b32.xlu1 %v2693_v20, %s1845_s25 }
 0x321   : > { %1234 = vperm.xlu0 %1760, %v2583_v49  }
 0x328   : > { %1426 = vperm.xlu2 %1776, %v2583_v49   ;;  %1266 = vperm.xlu1 %1762, %v2579_v33  }
 0x329   : > { %1251 = vrot.lane.b32.xlu0 %v2624_v44, %s1845_s25 }
 0x32a   : > { %1763 = vset.pattern.permute.xlu0 %v1853_v34  ;;  %v2779_v34 = vpop.permute.xlu2 %1226 }
 0x330   : > { %1779 = vset.pattern.permute.xlu2 %v1859_v35  ;;  %1281 = vrot.lane.b32.xlu1 %v2609_v30, %s1844_s24 }
 0x331   : > { %1446 = vperm.xlu2 %1779, %v2579_v33   ;;  %1270 = vperm.xlu0 %1763, %v2583_v49  }
 0x332   : > { %1765 = vset.pattern.permute.xlu1 %v1854_v48  ;;  %v2791_v39 = vpop.permute.xlu2 %1238 }
 0x338   : > { %1285 = vrot.lane.b32.xlu1 %v2693_v20, %s1844_s24 }
 0x339   : > { %1454 = vperm.xlu2 %1779, %v2617_v31   ;;  %1287 = vrot.lane.b32.xlu0 %v2624_v44, %s1844_s24 }
 0x33a   : > { %1766 = vset.pattern.permute.xlu0 %v1854_v48  ;;  %v2799_v48 = vpop.permute.xlu2 %1247 }
 0x340   : > { %1302 = vperm.xlu1 %1765, %v2579_v33  }
 0x341   : > { %1783 = vset.pattern.permute.xlu2 %v1860_v21  ;;  %1306 = vperm.xlu0 %1766, %v2583_v49  }
 0x342   : > { %1474 = vperm.xlu2 %1783, %v2583_v49   ;;  %v2821_v40 = vpop.permute.xlu2 %1262 }
 0x348   : > { %1317 = vrot.lane.b32.xlu1 %v2609_v30, %s1843_s23 }
 0x349   : > { %1323 = vrot.lane.b32.xlu0 %v2624_v44, %s1843_s23  ;;  %1768 = vset.pattern.permute.xlu1 %v1855_v38 }
 0x34a   : > { %1784 = vset.pattern.permute.xlu2 %v1861_v28  ;;  %1769 = vset.pattern.permute.xlu0 %v1855_v38  ;;  %v1170_v38 = vmul.f32 %v2829_v46, %v2707_v51  ;;  %v2842_v32 = vpop.permute.xlu2 %1274 }
 0x34b   : > { %1490 = vperm.xlu2 %1784, %v2598_v15  }
 0x34c   : > { %v1186_v61 = vmul.f32 %v2745_v56, %v1170_v38 }
 0x350   : > { %1321 = vrot.lane.b32.xlu1 %v2693_v20, %s1843_s23  ;;  %s2971_s23 = scalar_lea.vmem %s3124_s4, %s1704_s17 }
 0x351   : > { %1342 = vperm.xlu0 %1769, %v2583_v49  }
 0x352   : > { %v2862_v42 = vpop.permute.xlu2 %1283 }
 0x353   : > { %1502 = vperm.xlu2 %1784, %v2617_v31  }
 0x358   : > { %1338 = vperm.xlu1 %1768, %v2579_v33  }
 0x359   : > { %1359 = vrot.lane.b32.xlu0 %v2624_v44, %s1842_s22 }
 0x35a   : > { %1772 = vset.pattern.permute.xlu0 %v1856_v36 }
 0x35b   : > { %1788 = vset.pattern.permute.xlu2 %v1862_v25 }
 0x35c   : > { %1518 = vperm.xlu2 %1788, %v2579_v33  }
 0x360   : > { %1353 = vrot.lane.b32.xlu1 %v2609_v30, %s1842_s22 }
 0x361   : > { %1378 = vperm.xlu0 %1772, %v2583_v49   ;;  %1771 = vset.pattern.permute.xlu1 %v1856_v36 }
 0x362   : > { %v2814_v1 = vpop.permute.xlu0 %1117  ;;  %v2816_v13 = vpop.permute.xlu1 %1177 }
 0x363   : > { %v1127_v27 = vmul.f32 %v2814_v1, %v1107_v3 }
 0x364   : > { %1790 = vset.pattern.permute.xlu2 %v1863_v62 }
 0x365   : > { %v1563_v50 = vsel %vm442_vm0, %v1127_v27, %v1151_v26  ;;  %1538 = vperm.xlu2 %1790, %v2598_v15   ;;  %v2877_v26 = vpop.permute.xlu2 %1298 }
 0x368   : > { %1357 = vrot.lane.b32.xlu1 %v2693_v20, %s1842_s22 }
 0x369   : > { %1775 = vset.pattern.permute.xlu0 %v1857_v14 }
 0x36a   : > { %v1135_v0 = vpop.permute.xlu0 %1134  ;;  %v1195_v43 = vpop.permute.xlu1 %1194  ;;  %1406 = vperm.xlu0 %1775, %v2617_v31  }
 0x36b   : > { %v1146_v7 = vmul.f32 %v2829_v46, %v1135_v0  ;;  %v1206_v8 = vmul.f32 %v2829_v46, %v1195_v43 }
 0x36d   : > { %v1150_v45 = vmul.f32 %v1146_v7, %v2629_v22  ;;  %1546 = vperm.xlu2 %1790, %v2583_v49   ;;  %v1222_v58 = vmul.f32 %v2773_v60, %v1206_v8  ;;  %v1241_v7 = vmul.f32 %v2675_v23, %v2779_v34  ;;  %v1208_v8 = vmul.f32 %v2688_v53, %v2765_v24 }
 0x36f   : > { %v1562_v52 = vsel %vm442_vm0, %v1126_v10, %v1150_v45 }
 0x370   : > { %v1566_v63 = vsel %vm765_vm8, %v1562_v52, %v1186_v61  ;;  %1374 = vperm.xlu1 %1771, %v2579_v33  }
 0x371   : > { %v1571_v59 = vsel %vm1569_vm14, %v1566_v63, %v1222_v58  ;;  %v1311_v58 = vpop.permute.xlu2 %1310 }
 0x372   : > { %v2851_v2 = vpop.permute.xlu1 %1209  ;;  %1778 = vset.pattern.permute.xlu0 %v1859_v35 }
 0x373   : > { %v1221_v54 = vmul.f32 %v2851_v2, %v1205_v19  ;;  %v1163_v11 = vpop.permute.xlu0 %1162  ;;  %1442 = vperm.xlu0 %1778, %v2598_v15  }
 0x374   : > { %v1171_v51 = vmul.f32 %v2806_v37, %v1163_v11 }
 0x375   : > { %v1570_v16 = vsel %vm1569_vm14, %v2724_v41, %v1221_v54 }
 0x376   : > { %v1187_v4 = vmul.f32 %v2816_v13, %v1171_v51  ;;  %v1244_v51 = vmul.f32 %v2688_v53, %v2791_v39 }
 0x378   : > { %v1567_v36 = vsel %vm765_vm8, %v1563_v50, %v1187_v4  ;;  %1773 = vset.pattern.permute.xlu1 %v1857_v14 }
 0x379   : > { %1394 = vperm.xlu1 %1773, %v2598_v15   ;;  %v2911_v54 = vpop.permute.xlu2 %1319 }
 0x37a   : > { %v2867_v3 = vpop.permute.xlu1 %1213 }
 0x37b   : > { %1782 = vset.pattern.permute.xlu0 %v1860_v21  ;;  %v2870_v12 = vpop.permute.xlu0 %1179 }
 0x37c   : > { %v1188_v41 = vmul.f32 %v2870_v12, %v1172_v17  ;;  %1470 = vperm.xlu0 %1782, %v2579_v33  }
 0x37e   : > { %v1568_v14 = vsel %vm765_vm8, %v2704_v57, %v1188_v41  ;;  %v1277_v41 = vmul.f32 %v2675_v23, %v2821_v40 }
 0x381   : > { %1402 = vperm.xlu1 %1773, %v2583_v49  }
 0x382   : > { %v1231_v27 = vpop.permute.xlu1 %1230 }
 0x383   : > { %v1242_v47 = vmul.f32 %v2829_v46, %v1231_v27  ;;  %v1199_v50 = vpop.permute.xlu0 %1198 }
 0x384   : > { %v1207_v38 = vmul.f32 %v2806_v37, %v1199_v50  ;;  %1786 = vset.pattern.permute.xlu0 %v1861_v28 }
 0x385   : > { %v1258_v0 = vmul.f32 %v2799_v48, %v1242_v47  ;;  %1498 = vperm.xlu0 %1786, %v2583_v49  }
 0x386   : > { %v1223_v43 = vmul.f32 %v2867_v3, %v1207_v38 }
 0x387   : > { %v2886_v57 = vsel %vm1574_vm15, %v1571_v59, %v1258_v0 }
 0x388   : > { %v1572_v18 = vsel %vm1569_vm14, %v1567_v36, %v1223_v43 }
 0x389   : > { %1777 = vset.pattern.permute.xlu1 %v1858_v9 }
 0x38a   : > { %1422 = vperm.xlu1 %1777, %v2579_v33   ;;  %v2895_v10 = vpop.permute.xlu1 %1245 }
 0x38b   : > { %v1257_v45 = vmul.f32 %v2895_v10, %v1241_v7  ;;  %v2898_v61 = vpop.permute.xlu0 %1215 }
 0x38c   : > { %v1224_v52 = vmul.f32 %v2898_v61, %v1208_v8 }
 0x38d   : > { %v1575_v63 = vsel %vm1574_vm15, %v1570_v16, %v1257_v45  ;;  %1789 = vset.pattern.permute.xlu0 %v1862_v25 }
 0x38e   : > { %v1573_v9 = vsel %vm1569_vm14, %v1568_v14, %v1224_v52  ;;  %1526 = vperm.xlu0 %1789, %v2617_v31   ;;  %v1335_v14 = vpop.permute.xlu2 %1334 }
 0x392   : > { %1430 = vperm.xlu1 %1777, %v2617_v31   ;;  %v2906_v24 = vpop.permute.xlu1 %1249 }
 0x393   : > { %v1235_v34 = vpop.permute.xlu0 %1234 }
 0x394   : > { %v1243_v19 = vmul.f32 %v2806_v37, %v1235_v34  ;;  %v1316_v34 = vmul.f32 %v2688_v53, %v1311_v58 }
 0x396   : > { %v1259_v59 = vmul.f32 %v2906_v24, %v1243_v19  ;;  %1792 = vset.pattern.permute.xlu0 %v1863_v62  ;;  %v1347_v38 = vpop.permute.xlu2 %1346 }
 0x398   : > { %v2914_v11 = vsel %vm1574_vm15, %v1572_v18, %v1259_v59 }
 0x39a   : > { %1780 = vset.pattern.permute.xlu1 %v1859_v35  ;;  %v1267_v16 = vpop.permute.xlu1 %1266 }
 0x39b   : > { %1450 = vperm.xlu1 %1780, %v2583_v49   ;;  %v2920_v4 = vpop.permute.xlu0 %1251 }
 0x39c   : > { %v1260_v36 = vmul.f32 %v2920_v4, %v1244_v51  ;;  %v1352_v51 = vmul.f32 %v2688_v53, %v1347_v38 }
 0x39e   : > { %v1578_v17 = vsel %vm1574_vm15, %v1573_v9, %v1260_v36  ;;  %v2938_v18 = vpop.permute.xlu2 %1355 }
 0x3a2   : > { %v2926_v27 = vpop.permute.xlu1 %1281 }
 0x3a3   : > { %v1293_v47 = vmul.f32 %v2926_v27, %v1277_v41  ;;  %1781 = vset.pattern.permute.xlu1 %v1860_v21  ;;  %v1271_v35 = vpop.permute.xlu0 %1270 }
 0x3a4   : > { %1466 = vperm.xlu1 %1781, %v2598_v15  }
 0x3a5   : > { %v1580_v39 = vsel %vm1579_vm1, %v1575_v63, %v1293_v47  ;;  %v1278_v63 = vmul.f32 %v2829_v46, %v1267_v16 }
 0x3a6   : > { %v2947_v8 = vpop.permute.xlu2 %1370 }
 0x3a7   : > { %v1294_v19 = vmul.f32 %v2862_v42, %v1278_v63 }
 0x3a9   : > { %v1581_v58 = vsel %vm1579_vm1, %v2886_v57, %v1294_v19 }
 0x3aa   : > { %v2932_v50 = vpop.permute.xlu1 %1285 }
 0x3ab   : > { %v2934_v0 = vpop.permute.xlu0 %1287 }
 0x3ac   : > { %1478 = vperm.xlu1 %1781, %v2617_v31  }
 0x3b2   : > { %v1303_v40 = vpop.permute.xlu1 %1302 }
 0x3b3   : > { %v1307_v43 = vpop.permute.xlu0 %1306  ;;  %v1314_v9 = vmul.f32 %v2829_v46, %v1303_v40 }
 0x3b4   : > { %1785 = vset.pattern.permute.xlu1 %v1861_v28  ;;  %v1280_v28 = vmul.f32 %v2688_v53, %v2842_v32 }
 0x3b5   : > { %1494 = vperm.xlu1 %1785, %v2579_v33   ;;  %v1330_v16 = vmul.f32 %v2911_v54, %v1314_v9 }
 0x3b7   : > { %v1586_v38 = vsel %vm1584_vm2, %v1581_v58, %v1330_v16 }
 0x3ba   : > { %v2941_v21 = vpop.permute.xlu1 %1317 }
 0x3bb   : > { %v2943_v7 = vpop.permute.xlu0 %1323 }
 0x3bc   : > { %v1332_v59 = vmul.f32 %v2943_v7, %v1316_v34 }
 0x3bd   : > { %1787 = vset.pattern.permute.xlu1 %v1862_v25  ;;  %v1296_v25 = vmul.f32 %v2934_v0, %v1280_v28  ;;  %v1349_v28 = vmul.f32 %v2675_v23, %v1335_v14 }
 0x3be   : > { %1514 = vperm.xlu1 %1787, %v2598_v15   ;;  %v1383_v15 = vpop.permute.xlu2 %1382 }
 0x3c2   : > { %v2949_v45 = vpop.permute.xlu1 %1321 }
 0x3c3   : > { %v1343_v52 = vpop.permute.xlu0 %1342 }
 0x3c4   : > { %v1351_v14 = vmul.f32 %v2806_v37, %v1343_v52 }
 0x3c6   : > { %1522 = vperm.xlu1 %1787, %v2583_v49   ;;  %v1583_v49 = vsel %vm1579_vm1, %v1578_v17, %v1296_v25  ;;  %v1313_v17 = vmul.f32 %v2675_v23, %v2877_v26  ;;  %v1399_v26 = vpop.permute.xlu2 %1398 }
 0x3c7   : > { %v1588_v47 = vsel %vm1584_vm2, %v1583_v49, %v1332_v59 }
 0x3c8   : > { %v1329_v57 = vmul.f32 %v2941_v21, %v1313_v17 }
 0x3ca   : > { %v1339_v36 = vpop.permute.xlu1 %1338  ;;  %v1585_v25 = vsel %vm1584_vm2, %v1580_v39, %v1329_v57 }
 0x3cb   : > { %v1350_v32 = vmul.f32 %v2829_v46, %v1339_v36  ;;  %v2963_v41 = vpop.permute.xlu0 %1359 }
 0x3cc   : > { %v1368_v53 = vmul.f32 %v2963_v41, %v1352_v51 }
 0x3cd   : > { %v1366_v46 = vmul.f32 %v2938_v18, %v1350_v32  ;;  %v3010_v32 = vld [vmem:[%s1905_s20 + $0x18] sm:$0xff] }
 0x3ce   : > { %v1593_v40 = vsel %vm1589_vm3, %v1588_v47, %v1368_v53  ;;  %1791 = vset.pattern.permute.xlu1 %v1863_v62  ;;  %v1279_v62 = vmul.f32 %v2806_v37, %v1271_v35  ;;  %v1419_v36 = vpop.permute.xlu2 %1418 }
 0x3cf   : > { %v1591_v63 = vsel %vm1589_vm3, %v1586_v38, %v1366_v46  ;;  %1628 = vst [vmem:[%s2971_s23 + $0x30] sm:$0xff] %v1593_v40  ;;  %1542 = vperm.xlu1 %1791, %v2579_v33   ;;  %v1315_v33 = vmul.f32 %v2806_v37, %v1307_v43 }
 0x3d0   : > { %1624 = vst [vmem:[%s2971_s23 + $0x10] sm:$0xff] %v1591_v63  ;;  %v1295_v59 = vmul.f32 %v2932_v50, %v1279_v62 }
 0x3d1   : > { %v1331_v23 = vmul.f32 %v2949_v45, %v1315_v33 }
 0x3d2   : > { %v2989_v9 = vpop.permute.xlu1 %1353  ;;  %v1582_v39 = vsel %vm1579_vm1, %v2914_v11, %v1295_v59  ;;  %v3033_v59 = vld [vmem:[%s1905_s20 + $0x28] sm:$0xff] }
 0x3d3   : > { %v1365_v34 = vmul.f32 %v2989_v9, %v1349_v28  ;;  %v1587_v16 = vsel %vm1584_vm2, %v1582_v39, %v1331_v23  ;;  %v1379_v17 = vpop.permute.xlu0 %1378  ;;  %v3024_v28 = vld [vmem:[%s1905_s20 + $0x38] sm:$0xff] }
 0x3d5   : > { %v1590_v19 = vsel %vm1589_vm3, %v1585_v25, %v1365_v34 }
 0x3d6   : > { %1622 = vst [vmem:[%s2971_s23] sm:$0xff] %v1590_v19  ;;  %v1427_v53 = vpop.permute.xlu2 %1426 }
 0x3d7   : > { %1550 = vperm.xlu1 %1791, %v2617_v31   ;;  %v1410_v31 = vmul.f32 %v3010_v32, %v1399_v26 }
 0x3d9   : > { %v1414_v52 = vmul.f32 %v1410_v31, %v2629_v22 }
 0x3da   : > { %v3001_v51 = vpop.permute.xlu1 %1357 }
 0x3db   : > { %v1367_v35 = vmul.f32 %v3001_v51, %v1351_v14 }
 0x3dc   : > { %v1407_v57 = vpop.permute.xlu0 %1406 }
 0x3dd   : > { %v1592_v43 = vsel %vm1589_vm3, %v1587_v16, %v1367_v35  ;;  %v1412_v22 = vmul.f32 %v3024_v28, %v1407_v57 }
 0x3de   : > { %1626 = vst [vmem:[%s2971_s23 + $0x20] sm:$0xff] %v1592_v43  ;;  %v3019_v46 = vpop.permute.xlu2 %1446 }
 0x3df   : > { %v1416_v34 = vmul.f32 %v1412_v22, %v2624_v44 }
 0x3e2   : > { %v1375_v49 = vpop.permute.xlu1 %1374 }
 0x3e3   : > { %v1386_v37 = vmul.f32 %v3010_v32, %v1375_v49  ;;  %v1832_v49 = vld [vmem:[%s1905_s20 + $0x8] sm:$0xff] }
 0x3e4   : > { %v1433_v57 = vmul.f32 %v1832_v49, %v1419_v36 }
 0x3e5   : > { %v1390_v11 = vmul.f32 %v1386_v37, %v2671_v29  ;;  %v1388_v29 = vmul.f32 %v3024_v28, %v1383_v15  ;;  %v1387_v15 = vmul.f32 %v3033_v59, %v1379_v17 }
 0x3e6   : > { %v1455_v40 = vpop.permute.xlu2 %1454 }
 0x3e7   : > { %v3017_v58 = vsel %vm442_vm0, %v1390_v11, %v1414_v52  ;;  %v1460_v26 = vmul.f32 %v3024_v28, %v1455_v40  ;;  %v1392_v33 = vmul.f32 %v1388_v29, %v2680_v55  ;;  %v1435_v55 = vmul.f32 %v3033_v59, %v1427_v53 }
 0x3e8   : > { %v1391_v31 = vmul.f32 %v1387_v15, %v2814_v1 }
 0x3e9   : > { %v1464_v39 = vmul.f32 %v1460_v26, %v2898_v61  ;;  %v1597_v35 = vsel %vm442_vm0, %v1392_v33, %v1416_v34  ;;  %v1385_v61 = vmul.f32 %v1832_v49, %v2947_v8 }
 0x3eb   : > { %v1395_v47 = vpop.permute.xlu1 %1394  ;;  %v1389_v29 = vmul.f32 %v1385_v61, %v2669_v5 }
 0x3ec   : > { %v1409_v37 = vmul.f32 %v1832_v49, %v1395_v47  ;;  %v1443_v47 = vpop.permute.xlu0 %1442 }
 0x3ed   : > { %v1457_v34 = vmul.f32 %v1832_v49, %v1443_v47 }
 0x3ee   : > { %v1475_v62 = vpop.permute.xlu2 %1474  ;;  %v1413_v40 = vmul.f32 %v1409_v37, %v2609_v30 }
 0x3f3   : > { %v1403_v38 = vpop.permute.xlu1 %1402 }
 0x3f4   : > { %v1411_v23 = vmul.f32 %v3033_v59, %v1403_v38  ;;  %v1439_v38 = vmul.f32 %v1435_v55, %v2816_v13  ;;  %v1594_v13 = vsel %vm442_vm0, %v1389_v29, %v1413_v40 }
 0x3f6   : > { %v1415_v16 = vmul.f32 %v1411_v23, %v2693_v20  ;;  %v1491_v20 = vpop.permute.xlu2 %1490 }
 0x3f7   : > { %v1505_v30 = vmul.f32 %v1832_v49, %v1491_v20 }
 0x3f8   : > { %v1596_v11 = vsel %vm442_vm0, %v1391_v31, %v1415_v16  ;;  %v1471_v31 = vpop.permute.xlu0 %1470 }
 0x3f9   : > { %v1600_v22 = vsel %vm765_vm8, %v1596_v11, %v1439_v38  ;;  %v1509_v5 = vmul.f32 %v1505_v30, %v2926_v27  ;;  %v1482_v47 = vmul.f32 %v3010_v32, %v1471_v31 }
 0x3fc   : > { %v3021_v63 = vpop.permute.xlu1 %1422 }
 0x400   : > { %v1499_v11 = vpop.permute.xlu0 %1498 }
 0x404   : > { %v1431_v25 = vpop.permute.xlu1 %1430 }
 0x405   : > { %v1436_v19 = vmul.f32 %v3024_v28, %v1431_v25  ;;  %v1437_v25 = vmul.f32 %v1433_v57, %v2714_v6 }
 0x407   : > { %v1440_v14 = vmul.f32 %v1436_v19, %v2870_v12  ;;  %v1483_v12 = vmul.f32 %v3033_v59, %v1475_v62  ;;  %v1503_v19 = vpop.permute.xlu2 %1502 }
 0x408   : > { %v1508_v6 = vmul.f32 %v3024_v28, %v1503_v19 }
 0x409   : > { %v1601_v44 = vsel %vm765_vm8, %v1597_v35, %v1440_v14  ;;  %v1487_v1 = vmul.f32 %v1483_v12, %v2906_v24  ;;  %v1461_v24 = vmul.f32 %v1457_v34, %v2851_v2 }
 0x40a   : > { %v1605_v43 = vsel %vm1569_vm14, %v1601_v44, %v1464_v39  ;;  %v1512_v2 = vmul.f32 %v1508_v6, %v2934_v0 }
 0x40d   : > { %v1451_v52 = vpop.permute.xlu1 %1450 }
 0x40e   : > { %v1459_v17 = vmul.f32 %v3033_v59, %v1451_v52 }
 0x40f   : > { %v1519_v16 = vpop.permute.xlu2 %1518 }
 0x410   : > { %v1463_v53 = vmul.f32 %v1459_v17, %v2867_v3  ;;  %v1598_v3 = vsel %vm765_vm8, %v1594_v13, %v1437_v25  ;;  %v1434_v17 = vmul.f32 %v3010_v32, %v3021_v63  ;;  %v1530_v25 = vmul.f32 %v3010_v32, %v1519_v16 }
 0x411   : > { %v1602_v23 = vsel %vm1569_vm14, %v1598_v3, %v1461_v24 }
 0x412   : > { %v1604_v8 = vsel %vm1569_vm14, %v1600_v22, %v1463_v53  ;;  %v1438_v53 = vmul.f32 %v1434_v17, %v2745_v56  ;;  %v1534_v30 = vmul.f32 %v1530_v25, %v2911_v54 }
 0x413   : > { %v1608_v26 = vsel %vm1574_vm15, %v1604_v8, %v1487_v1 }
 0x414   : > { %v1599_v22 = vsel %vm765_vm8, %v3017_v58, %v1438_v53  ;;  %v1486_v58 = vmul.f32 %v1482_v47, %v2799_v48 }
 0x416   : > { %v1467_v62 = vpop.permute.xlu1 %1466 }
 0x417   : > { %v1481_v36 = vmul.f32 %v1832_v49, %v1467_v62  ;;  %v1539_v37 = vpop.permute.xlu2 %1538  ;;  %v1527_v62 = vpop.permute.xlu0 %1526 }
 0x418   : > { %v1553_v61 = vmul.f32 %v1832_v49, %v1539_v37  ;;  %v1532_v48 = vmul.f32 %v3024_v28, %v1527_v62 }
 0x419   : > { %v1485_v33 = vmul.f32 %v1481_v36, %v2895_v10 }
 0x41a   : > { %v1557_v0 = vmul.f32 %v1553_v61, %v2989_v9 }
 0x41b   : > { %v1606_v14 = vsel %vm1574_vm15, %v1602_v23, %v1485_v33  ;;  %v1536_v33 = vmul.f32 %v1532_v48, %v2943_v7 }
 0x41c   : > { %v1610_v39 = vsel %vm1579_vm1, %v1606_v14, %v1509_v5 }
 0x41e   : > { %v1479_v15 = vpop.permute.xlu1 %1478 }
 0x41f   : > { %v1484_v35 = vmul.f32 %v3024_v28, %v1479_v15  ;;  %v1547_v40 = vpop.permute.xlu2 %1546 }
 0x421   : > { %v1488_v44 = vmul.f32 %v1484_v35, %v2920_v4 }
 0x423   : > { %v1609_v10 = vsel %vm1574_vm15, %v1605_v43, %v1488_v44  ;;  %v1507_v43 = vmul.f32 %v3033_v59, %v1499_v11 }
 0x424   : > { %v1613_v27 = vsel %vm1579_vm1, %v1609_v10, %v1512_v2 }
 0x425   : > { %v1511_v9 = vmul.f32 %v1507_v43, %v2932_v50 }
 0x427   : > { %v1495_v55 = vpop.permute.xlu1 %1494  ;;  %v1612_v8 = vsel %vm1579_vm1, %v1608_v26, %v1511_v9 }
 0x428   : > { %v1506_v1 = vmul.f32 %v3010_v32, %v1495_v55 }
 0x42a   : > { %v1510_v50 = vmul.f32 %v1506_v1, %v2862_v42 }
 0x430   : > { %v1515_v12 = vpop.permute.xlu1 %1514 }
 0x431   : > { %v1529_v52 = vmul.f32 %v1832_v49, %v1515_v12  ;;  %v1458_v49 = vmul.f32 %v3010_v32, %v3019_v46 }
 0x433   : > { %v1533_v4 = vmul.f32 %v1529_v52, %v2941_v21  ;;  %v1555_v21 = vmul.f32 %v3033_v59, %v1547_v40  ;;  %v1462_v29 = vmul.f32 %v1458_v49, %v2773_v60 }
 0x435   : > { %v1614_v38 = vsel %vm1584_vm2, %v1610_v39, %v1533_v4  ;;  %v1559_v46 = vmul.f32 %v1555_v21, %v3001_v51 }
 0x436   : > { %v1618_v20 = vsel %vm1589_vm3, %v1614_v38, %v1557_v0 }
 0x437   : > { %1623 = vst [vmem:[%s2971_s23 + $0x8] sm:$0xff] %v1618_v20 }
 0x438   : > { %v1523_v57 = vpop.permute.xlu1 %1522 }
 0x439   : > { %v1531_v63 = vmul.f32 %v3033_v59, %v1523_v57  ;;  %v1603_v59 = vsel %vm1569_vm14, %v1599_v22, %v1462_v29 }
 0x43a   : > { %v1607_v60 = vsel %vm1574_vm15, %v1603_v59, %v1486_v58 }
 0x43b   : > { %v1535_v56 = vmul.f32 %v1531_v63, %v2949_v45  ;;  %v1611_v51 = vsel %vm1579_vm1, %v1607_v60, %v1510_v50 }
 0x43c   : > { %v1615_v3 = vsel %vm1584_vm2, %v1611_v51, %v1534_v30 }
 0x43d   : > { %v1616_v34 = vsel %vm1584_vm2, %v1612_v8, %v1535_v56 }
 0x43e   : > { %v1620_v13 = vsel %vm1589_vm3, %v1616_v34, %v1559_v46 }
 0x43f   : > { %1627 = vst [vmem:[%s2971_s23 + $0x28] sm:$0xff] %v1620_v13 }
 0x441   : > { %v1543_v45 = vpop.permute.xlu1 %1542 }
 0x442   : > { %v1554_v26 = vmul.f32 %v3010_v32, %v1543_v45  ;;  %v1617_v32 = vsel %vm1584_vm2, %v1613_v27, %v1536_v33 }
 0x444   : > { %v1558_v42 = vmul.f32 %v1554_v26, %v2938_v18 }
 0x446   : > { %v1619_v36 = vsel %vm1589_vm3, %v1615_v3, %v1558_v42 }
 0x447   : > { %1625 = vst [vmem:[%s2971_s23 + $0x18] sm:$0xff] %v1619_v36 }
 0x449   : > { %v1551_v24 = vpop.permute.xlu1 %1550 }
 0x44a   : > { %v1556_v19 = vmul.f32 %v3024_v28, %v1551_v24 }
 0x44c   : > { %v1560_v5 = vmul.f32 %v1556_v19, %v2963_v41 }
 0x44e   : > { %v1621_v54 = vsel %vm1589_vm3, %v1617_v32, %v1560_v5 }
 0x44f   : > { %1629 = vst [vmem:[%s2971_s23 + $0x38] sm:$0xff] %v1621_v54 }
 0x450 PF: > { %s14_s15 = sadd.s32 1, %s1839_s15  }
 0x451   : > { %p11_p4 = scmp.ge.s32.totalorder %s14_s15, 4  }
 0x453   :  { %13 = sbr.rel (!%p11_p4) target bundleno = 1 (0x1), region = 66 }

</bundles_post_ra>
